<compile_context>
chip_gen: v6e
topology: v6e:2x2x1
jax: 0.10.0
libtpu: 0.0.40
codegen_flags: <defaults>
</compile_context>

<pallas_src>
import functools

import jax
import jax.numpy as jnp
from jax.experimental import pallas as pl
from jax.experimental.pallas import tpu as pltpu


def _layer_norm(x, gamma, beta, eps=1e-5):
    mean = jnp.mean(x, axis=-1, keepdims=True)
    var = jnp.mean((x - mean) ** 2, axis=-1, keepdims=True)
    return (x - mean) * jax.lax.rsqrt(var + eps) * gamma + beta


def decoder_layer_kernel(
    x_blk_ref,        # (TQ, D)       f32   query-block tile of x (residual + Q)
    x_full_ref,       # (S, D)        f32   full sequence (used only at qi == 0)
    w_q_ref,          # (D, D)        bf16  Wq with 1/sqrt(dh) folded in
    b_q_ref,          # (1, D)        f32   bq with 1/sqrt(dh) folded in
    w_kv_ref,         # (D, 2D)       bf16  fused [Wk | Wv]
    b_kv_ref,         # (1, 2D)       f32
    wo_h_ref,         # (H, dh, D)    bf16  out-proj weight, head-major rows
    w1_ref,           # (D, dff)      bf16
    b1_ref,           # (1, dff)      f32
    w2_ref,           # (dff, D)      bf16
    vecd_ref,         # (6, D)        f32   [ln1_g, ln1_b, ln2_g, ln2_b, bo, b2]
    y_ref,            # (TQ, D)       f32   output tile
    attn_ref,         # (TQ, S)       attn_dtype  head-averaged attention tile
    k_scr, v_scr,     # (H, S, dh)    bf16  persistent per-batch K/V scratch
    q_scr,            # (H, TQ, dh)   bf16  per-block Q scratch
    s_scr,            # (Hc, TQ, S)   f32   per-chunk scores / probs
    ctx_scr,          # (Hc, TQ, dh)  f32   per-chunk context accumulator
    attn_acc,         # (TQ, S)       f32   head-sum attention accumulator
    out_acc,          # (TQ, D)       f32   attention-output accumulator
    *, num_heads, head_chunk,
):
    qi = pl.program_id(1)
    TQ, D = x_blk_ref.shape
    S = x_full_ref.shape[0]
    H = num_heads
    dh = D // H
    Hc = head_chunk
    n_chunks = H // Hc
    n_kb = S // TQ

    bf16, f32 = jnp.bfloat16, jnp.float32

    ln1_g = vecd_ref[0:1, :]
    ln1_b = vecd_ref[1:2, :]
    ln2_g = vecd_ref[2:3, :]
    ln2_b = vecd_ref[3:4, :]
    bo = vecd_ref[4:5, :]
    b2 = vecd_ref[5:6, :]

    # ---- once per batch: LN1 + fused K/V projection into head-major scratch
    @pl.when(qi == 0)
    def _():
        xn = _layer_norm(x_full_ref[...], ln1_g, ln1_b)
        kv = (jnp.dot(xn.astype(bf16), w_kv_ref[...],
                      preferred_element_type=f32) + b_kv_ref[...]).astype(bf16)
        # TODO(synk): replace the per-head scatter with a single lane->head-major
        # relayout (pltpu.einshape) once the split-reshape path is verified.
        for h in range(H):
            k_scr[h] = kv[:, h * dh:(h + 1) * dh]
            v_scr[h] = kv[:, D + h * dh:D + (h + 1) * dh]

    # ---- per query block: LN1 + Q projection (scale pre-folded into Wq/bq) --
    x_blk = x_blk_ref[...]
    xn1 = _layer_norm(x_blk, ln1_g, ln1_b)
    q2d = (jnp.dot(xn1.astype(bf16), w_q_ref[...], preferred_element_type=f32)
           + b_q_ref[...]).astype(bf16)
    for h in range(H):
        q_scr[h] = q2d[:, h * dh:(h + 1) * dh]

    attn_acc[...] = jnp.zeros(attn_acc.shape, f32)
    out_acc[...] = jnp.zeros(out_acc.shape, f32)

    q0 = qi * TQ
    row = q0 + jax.lax.broadcasted_iota(jnp.int32, (TQ, TQ), 0)

    # ---- masked attention, head-chunked so live f32 stays O(Hc*TQ*S) --------
    def head_chunk_body(c, carry):
        h0 = pl.multiple_of(c * Hc, Hc)
        q_c = q_scr[pl.ds(h0, Hc)]                              # (Hc, TQ, dh)

        # QK^T: skip fully-masked (future) k-blocks entirely.
        s_scr[...] = jnp.full(s_scr.shape, -1e30, f32)
        for kb in range(n_kb):
            @pl.when(kb <= qi)
            def _():
                k_b = k_scr[pl.ds(h0, Hc), kb * TQ:(kb + 1) * TQ, :]
                s_b = jnp.einsum('hqd,hkd->hqk', q_c, k_b,
                                 preferred_element_type=f32)    # (Hc, TQ, TQ)
                col = kb * TQ + jax.lax.broadcasted_iota(jnp.int32, (TQ, TQ), 1)
                s_b = jnp.where((row >= col)[None], s_b, -1e30)
                s_scr[:, :, kb * TQ:(kb + 1) * TQ] = s_b

        s = s_scr[...]
        m = jnp.max(s, axis=-1, keepdims=True)
        p = jnp.exp(s - m)                                      # masked cols -> 0
        inv_l = 1.0 / jnp.sum(p, axis=-1, keepdims=True)        # exact (softmax parity)
        p = p * inv_l
        attn_acc[...] += jnp.sum(p, axis=0)

        # P@V: skip fully-masked k-blocks as well.
        ctx_scr[...] = jnp.zeros(ctx_scr.shape, f32)
        p16 = p.astype(bf16)
        for kb in range(n_kb):
            @pl.when(kb <= qi)
            def _():
                v_b = v_scr[pl.ds(h0, Hc), kb * TQ:(kb + 1) * TQ, :]
                ctx_scr[...] += jnp.einsum(
                    'hqk,hkd->hqd', p16[:, :, kb * TQ:(kb + 1) * TQ], v_b,
                    preferred_element_type=f32)

        # chunked output projection (heads of the chunk batched per MXU call).
        proj = jnp.einsum('hqd,hde->hqe', ctx_scr[...].astype(bf16),
                          wo_h_ref[pl.ds(h0, Hc)], preferred_element_type=f32)
        out_acc[...] += jnp.sum(proj, axis=0)
        return carry

    jax.lax.fori_loop(0, n_chunks, head_chunk_body, 0)

    attn_ref[...] = (attn_acc[...] * (1.0 / H)).astype(attn_ref.dtype)

    # ---- residual + feed-forward sublayer (Pre-LN) ---------------------------
    x1 = x_blk + out_acc[...] + bo
    xn2 = _layer_norm(x1, ln2_g, ln2_b)
    h1 = jnp.maximum(jnp.dot(xn2.astype(bf16), w1_ref[...],
                             preferred_element_type=f32) + b1_ref[...], 0.0)
    h2 = jnp.dot(h1.astype(bf16), w2_ref[...], preferred_element_type=f32) + b2
    y_ref[...] = x1 + h2


def self_attention_decoder_layer(x, params, num_heads, block_q=None,
                                 head_chunk=None, attn_dtype=jnp.bfloat16):
    """x: (B, S, D) float32.  Returns (y (B,S,D) f32, attn_weights (B,S,S))."""
    B, S, D = x.shape
    assert D % num_heads == 0, "d_model must be divisible by num_heads"
    H = num_heads
    dh = D // H
    dff = params["w1"].shape[1]

    if block_q is None:
        # v5e/v6e (128 MiB VMEM): can sweep up to 256; v7x (64 MiB/TC): keep <= 128.
        block_q = S if S <= 128 else 128
    assert S % block_q == 0
    nq = S // block_q

    if head_chunk is None:
        head_chunk = 4 if (H % 4 == 0 and H >= 8) else (2 if H % 2 == 0 else 1)
    assert H % head_chunk == 0

    f32, bf16 = jnp.float32, jnp.bfloat16
    scale = 1.0 / (dh ** 0.5)

    # ---- host-side one-time parameter prep --------------------------------
    w_q = (params["wq"] * scale).astype(bf16)                      # scale folded
    b_q = (params["bq"].reshape(1, D) * scale).astype(f32)
    w_kv = jnp.concatenate([params["wk"], params["wv"]], axis=1).astype(bf16)
    b_kv = jnp.concatenate([params["bk"].reshape(1, D),
                            params["bv"].reshape(1, D)], axis=1).astype(f32)
    wo_h = params["wo"].reshape(H, dh, D).astype(bf16)
    w1 = params["w1"].astype(bf16)
    b1 = params["b1"].reshape(1, dff).astype(f32)
    w2 = params["w2"].astype(bf16)
    vec_d = jnp.concatenate(
        [params["ln1_g"].reshape(1, D), params["ln1_b"].reshape(1, D),
         params["ln2_g"].reshape(1, D), params["ln2_b"].reshape(1, D),
         params["bo"].reshape(1, D), params["b2"].reshape(1, D)],
        axis=0).astype(f32)

    def _const_spec(p):
        nd = p.ndim
        return pl.BlockSpec(p.shape, lambda b, q, _nd=nd: (0,) * _nd)

    in_specs = [
        pl.BlockSpec((None, block_q, D), lambda b, q: (b, q, 0)),   # x tile
        pl.BlockSpec((None, S, D), lambda b, q: (b, 0, 0)),         # x full (qi==0)
        _const_spec(w_q), _const_spec(b_q),
        _const_spec(w_kv), _const_spec(b_kv),
        _const_spec(wo_h),
        _const_spec(w1), _const_spec(b1), _const_spec(w2),
        _const_spec(vec_d),
    ]
    out_specs = (
        pl.BlockSpec((None, block_q, D), lambda b, q: (b, q, 0)),
        pl.BlockSpec((None, block_q, S), lambda b, q: (b, q, 0)),
    )
    scratch_shapes = [
        pltpu.VMEM((H, S, dh), bf16),                 # K (head-major)
        pltpu.VMEM((H, S, dh), bf16),                 # V (head-major)
        pltpu.VMEM((H, block_q, dh), bf16),           # Q (per block)
        pltpu.VMEM((head_chunk, block_q, S), f32),    # per-chunk scores/probs
        pltpu.VMEM((head_chunk, block_q, dh), f32),   # per-chunk context
        pltpu.VMEM((block_q, S), f32),                # attn accumulator
        pltpu.VMEM((block_q, D), f32),                # attn-output accumulator
    ]

    # ---- explicit VMEM budget (review: size it, don't just comment) -------
    def _nbytes(shape, dtype):
        n = 1
        for s in shape:
            n *= int(s)
        return n * jnp.dtype(dtype).itemsize

    est = 0
    for shp, dt in [((block_q, D), f32), ((S, D), f32), ((D, D), bf16),
                    ((1, D), f32), ((D, 2 * D), bf16), ((1, 2 * D), f32),
                    ((H, dh, D), bf16), ((D, dff), bf16), ((1, dff), f32),
                    ((dff, D), bf16), ((6, D), f32),
                    ((block_q, D), f32), ((block_q, S), attn_dtype)]:
        est += 2 * _nbytes(shp, dt)         # inputs/outputs are double-buffered
    est += 2 * _nbytes((H, S, dh), bf16)
    est += _nbytes((H, block_q, dh), bf16)
    est += _nbytes((head_chunk, block_q, S), f32)
    est += _nbytes((head_chunk, block_q, dh), f32)
    est += _nbytes((block_q, S), f32) + _nbytes((block_q, D), f32)
    vmem_limit = int(min(100 * 1024 * 1024, max(32 * 1024 * 1024, 2 * est)))

    kernel = functools.partial(decoder_layer_kernel,
                               num_heads=H, head_chunk=head_chunk)

    return pl.pallas_call(
        kernel,
        out_shape=(
            jax.ShapeDtypeStruct((B, S, D), f32),
            jax.ShapeDtypeStruct((B, S, S), attn_dtype),
        ),
        grid=(B, nq),
        in_specs=in_specs,
        out_specs=out_specs,
        scratch_shapes=scratch_shapes,
        compiler_params=pltpu.CompilerParams(
            dimension_semantics=("parallel", "arbitrary"),
            vmem_limit_bytes=vmem_limit),
    )(x, x, w_q, b_q, w_kv, b_kv, wo_h, w1, b1, w2, vec_d)


def init_params(key, d_model, d_ff):
    ks = jax.random.split(key, 8)
    s = 0.02
    return {
        "ln1_g": jnp.ones((1, d_model), jnp.float32),
        "ln1_b": jnp.zeros((1, d_model), jnp.float32),
        "wq": s * jax.random.normal(ks[0], (d_model, d_model), jnp.float32),
        "bq": jnp.zeros((1, d_model), jnp.float32),
        "wk": s * jax.random.normal(ks[1], (d_model, d_model), jnp.float32),
        "bk": jnp.zeros((1, d_model), jnp.float32),
        "wv": s * jax.random.normal(ks[2], (d_model, d_model), jnp.float32),
        "bv": jnp.zeros((1, d_model), jnp.float32),
        "wo": s * jax.random.normal(ks[3], (d_model, d_model), jnp.float32),
        "bo": jnp.zeros((1, d_model), jnp.float32),
        "ln2_g": jnp.ones((1, d_model), jnp.float32),
        "ln2_b": jnp.zeros((1, d_model), jnp.float32),
        "w1": s * jax.random.normal(ks[4], (d_model, d_ff), jnp.float32),
        "b1": jnp.zeros((1, d_ff), jnp.float32),
        "w2": s * jax.random.normal(ks[5], (d_ff, d_model), jnp.float32),
        "b2": jnp.zeros((1, d_model), jnp.float32),
    }


def reference_forward(x, params, num_heads):
    """Pure-JAX f32 reference (same semantics as the PyTorch module)."""
    B, S, D = x.shape
    H = num_heads
    dh = D // H

    def ln(v, g, b, eps=1e-5):
        m = v.mean(-1, keepdims=True)
        var = ((v - m) ** 2).mean(-1, keepdims=True)
        return (v - m) / jnp.sqrt(var + eps) * g + b

    xn = ln(x, params["ln1_g"], params["ln1_b"])
    q = xn @ params["wq"] + params["bq"]
    k = xn @ params["wk"] + params["bk"]
    v = xn @ params["wv"] + params["bv"]
    q = q.reshape(B, S, H, dh).transpose(0, 2, 1, 3)
    k = k.reshape(B, S, H, dh).transpose(0, 2, 1, 3)
    v = v.reshape(B, S, H, dh).transpose(0, 2, 1, 3)
    s = jnp.einsum('bhqd,bhkd->bhqk', q, k) / jnp.sqrt(jnp.float32(dh))
    mask = jnp.tril(jnp.ones((S, S), bool))
    s = jnp.where(mask, s, -1e30)
    p = jax.nn.softmax(s, axis=-1)
    attn_w = p.mean(axis=1)
    ctx = jnp.einsum('bhqk,bhkd->bhqd', p, v).transpose(0, 2, 1, 3).reshape(B, S, D)
    x1 = x + ctx @ params["wo"] + params["bo"]
    xn2 = ln(x1, params["ln2_g"], params["ln2_b"])
    h1 = jnp.maximum(xn2 @ params["w1"] + params["b1"], 0.0)
    y = x1 + h1 @ params["w2"] + params["b2"]
    return y, attn_w


if __name__ == "__main__":
    B, S, D, H, DFF = 2, 16, 32, 4, 64
    key = jax.random.PRNGKey(0)
    kx, kp = jax.random.split(key)
    x = jax.random.normal(kx, (B, S, D), jnp.float32)
    params = init_params(kp, D, DFF)

    y, attn = self_attention_decoder_layer(x, params, num_heads=H, block_q=8)
    jax.block_until_ready((y, attn))

    y_ref, attn_ref = reference_forward(x, params, num_heads=H)
    attn_f32 = attn.astype(jnp.float32)

    assert y.shape == (B, S, D) and attn.shape == (B, S, S)
    assert bool(jnp.all(jnp.isfinite(y))) and bool(jnp.all(jnp.isfinite(attn_f32)))
    # attention rows are probability distributions (bf16 output -> loose tol)
    assert bool(jnp.allclose(jnp.sum(attn_f32, axis=-1), 1.0, atol=2e-2))
    # bf16-operand matmuls with f32 accumulation -> compare loosely vs f32 ref
    assert float(jnp.max(jnp.abs(y - y_ref))) < 5e-2
    assert float(jnp.max(jnp.abs(attn_f32 - attn_ref))) < 2e-2
    print("KERNEL_OK")
</pallas_src>

<mosaic_0001>
module attributes {stable_mosaic.version = 11 : i64} {
  func.func @decoder_layer_kernel(%arg0: i32, %arg1: i32, %arg2: memref<1x8x32xf32, #tpu.memory_space<vmem>>, %arg3: memref<1x16x32xf32, #tpu.memory_space<vmem>>, %arg4: memref<32x32xbf16, #tpu.memory_space<vmem>>, %arg5: memref<1x32xf32, #tpu.memory_space<vmem>>, %arg6: memref<32x64xbf16, #tpu.memory_space<vmem>>, %arg7: memref<1x64xf32, #tpu.memory_space<vmem>>, %arg8: memref<4x8x32xbf16, #tpu.memory_space<vmem>>, %arg9: memref<32x64xbf16, #tpu.memory_space<vmem>>, %arg10: memref<1x64xf32, #tpu.memory_space<vmem>>, %arg11: memref<64x32xbf16, #tpu.memory_space<vmem>>, %arg12: memref<6x32xf32, #tpu.memory_space<vmem>>, %arg13: memref<1x8x32xf32, #tpu.memory_space<vmem>>, %arg14: memref<1x8x16xbf16, #tpu.memory_space<vmem>>, %arg15: memref<4x16x8xbf16, #tpu.memory_space<vmem>>, %arg16: memref<4x16x8xbf16, #tpu.memory_space<vmem>>, %arg17: memref<4x8x8xbf16, #tpu.memory_space<vmem>>, %arg18: memref<2x8x16xf32, #tpu.memory_space<vmem>>, %arg19: memref<2x8x8xf32, #tpu.memory_space<vmem>>, %arg20: memref<8x16xf32, #tpu.memory_space<vmem>>, %arg21: memref<8x32xf32, #tpu.memory_space<vmem>>) attributes {dimension_semantics = [#tpu.dimension_semantics<parallel>, #tpu.dimension_semantics<arbitrary>], iteration_bounds = array<i64: 2, 2>, scalar_prefetch = 0 : i64, scratch_operands = 7 : i64, tpu.core_type = #tpu.core_type<tc>, window_params = [{transform_indices = @transform_0, window_bounds = array<i64: 1, 8, 32>}, {transform_indices = @transform_1, window_bounds = array<i64: 1, 16, 32>}, {pipeline_mode = #tpu.pipeline_mode<synchronous>, transform_indices = @transform_2, window_bounds = array<i64: 32, 32>}, {pipeline_mode = #tpu.pipeline_mode<synchronous>, transform_indices = @transform_3, window_bounds = array<i64: 1, 32>}, {pipeline_mode = #tpu.pipeline_mode<synchronous>, transform_indices = @transform_4, window_bounds = array<i64: 32, 64>}, {pipeline_mode = #tpu.pipeline_mode<synchronous>, transform_indices = @transform_5, window_bounds = array<i64: 1, 64>}, {pipeline_mode = #tpu.pipeline_mode<synchronous>, transform_indices = @transform_6, window_bounds = array<i64: 4, 8, 32>}, {pipeline_mode = #tpu.pipeline_mode<synchronous>, transform_indices = @transform_7, window_bounds = array<i64: 32, 64>}, {pipeline_mode = #tpu.pipeline_mode<synchronous>, transform_indices = @transform_8, window_bounds = array<i64: 1, 64>}, {pipeline_mode = #tpu.pipeline_mode<synchronous>, transform_indices = @transform_9, window_bounds = array<i64: 64, 32>}, {pipeline_mode = #tpu.pipeline_mode<synchronous>, transform_indices = @transform_10, window_bounds = array<i64: 6, 32>}, {transform_indices = @transform_11, window_bounds = array<i64: 1, 8, 32>}, {transform_indices = @transform_12, window_bounds = array<i64: 1, 8, 16>}]} {
    %c0 = arith.constant 0 : index
    %c0_0 = arith.constant 0 : index
    %0 = vector.load %arg12[%c0, %c0_0] : memref<6x32xf32, #tpu.memory_space<vmem>>, vector<1x32xf32>
    %c1 = arith.constant 1 : index
    %c0_1 = arith.constant 0 : index
    %1 = vector.load %arg12[%c1, %c0_1] : memref<6x32xf32, #tpu.memory_space<vmem>>, vector<1x32xf32>
    %c2 = arith.constant 2 : index
    %c0_2 = arith.constant 0 : index
    %2 = vector.load %arg12[%c2, %c0_2] : memref<6x32xf32, #tpu.memory_space<vmem>>, vector<1x32xf32>
    %c3 = arith.constant 3 : index
    %c0_3 = arith.constant 0 : index
    %3 = vector.load %arg12[%c3, %c0_3] : memref<6x32xf32, #tpu.memory_space<vmem>>, vector<1x32xf32>
    %c4 = arith.constant 4 : index
    %c0_4 = arith.constant 0 : index
    %4 = vector.load %arg12[%c4, %c0_4] : memref<6x32xf32, #tpu.memory_space<vmem>>, vector<1x32xf32>
    %c5 = arith.constant 5 : index
    %c0_5 = arith.constant 0 : index
    %5 = vector.load %arg12[%c5, %c0_5] : memref<6x32xf32, #tpu.memory_space<vmem>>, vector<1x32xf32>
    %c0_i32 = arith.constant 0 : i32
    %6 = arith.cmpi eq, %arg1, %c0_i32 : i32
    %7 = arith.extui %6 : i1 to i32
    %c0_i32_6 = arith.constant 0 : i32
    %8 = arith.cmpi ne, %7, %c0_i32_6 : i32
    scf.if %8 {
      %c0_64 = arith.constant 0 : index
      %c0_65 = arith.constant 0 : index
      %c0_66 = arith.constant 0 : index
      %115 = vector.load %arg3[%c0_64, %c0_65, %c0_66] : memref<1x16x32xf32, #tpu.memory_space<vmem>>, vector<1x16x32xf32>
      %116 = vector.shape_cast %115 : vector<1x16x32xf32> to vector<16x32xf32>
      %cst_67 = arith.constant dense<0.000000e+00> : vector<16xf32>
      %117 = vector.multi_reduction <add>, %116, %cst_67 [1] : vector<16x32xf32> to vector<16xf32>
      %118 = vector.shape_cast %117 : vector<16xf32> to vector<16x1xf32>
      %cst_68 = arith.constant 3.200000e+01 : f32
      %119 = vector.broadcast %cst_68 : f32 to vector<16x1xf32>
      %120 = arith.divf %118, %119 : vector<16x1xf32>
      %121 = vector.broadcast %120 : vector<16x1xf32> to vector<16x32xf32>
      %122 = arith.subf %116, %121 : vector<16x32xf32>
      %123 = arith.mulf %122, %122 : vector<16x32xf32>
      %cst_69 = arith.constant dense<0.000000e+00> : vector<16xf32>
      %124 = vector.multi_reduction <add>, %123, %cst_69 [1] : vector<16x32xf32> to vector<16xf32>
      %125 = vector.shape_cast %124 : vector<16xf32> to vector<16x1xf32>
      %cst_70 = arith.constant 3.200000e+01 : f32
      %126 = vector.broadcast %cst_70 : f32 to vector<16x1xf32>
      %127 = arith.divf %125, %126 : vector<16x1xf32>
      %128 = vector.broadcast %120 : vector<16x1xf32> to vector<16x32xf32>
      %129 = arith.subf %116, %128 : vector<16x32xf32>
      %cst_71 = arith.constant 9.99999974E-6 : f32
      %130 = vector.broadcast %cst_71 : f32 to vector<16x1xf32>
      %131 = arith.addf %127, %130 : vector<16x1xf32>
      %132 = math.rsqrt %131 : vector<16x1xf32>
      %133 = vector.broadcast %132 : vector<16x1xf32> to vector<16x32xf32>
      %134 = arith.mulf %129, %133 : vector<16x32xf32>
      %135 = vector.broadcast %0 : vector<1x32xf32> to vector<16x32xf32>
      %136 = arith.mulf %134, %135 : vector<16x32xf32>
      %137 = vector.broadcast %1 : vector<1x32xf32> to vector<16x32xf32>
      %138 = arith.addf %136, %137 : vector<16x32xf32>
      %139 = arith.truncf %138 : vector<16x32xf32> to vector<16x32xbf16>
      %c0_72 = arith.constant 0 : index
      %c0_73 = arith.constant 0 : index
      %140 = vector.load %arg6[%c0_72, %c0_73] : memref<32x64xbf16, #tpu.memory_space<vmem>>, vector<32x64xbf16>
      %cst_74 = arith.constant dense<0.000000e+00> : vector<16x64xf32>
      %141 = tpu.matmul %139, %140, %cst_74 {dimension_numbers = #tpu.dot_dimension_numbers<[1], [0], [0], [1], [0, 0, 1, 1], [], []>} : vector<16x32xbf16>, vector<32x64xbf16>, vector<16x64xf32> -> vector<16x64xf32>
      %c0_75 = arith.constant 0 : index
      %c0_76 = arith.constant 0 : index
      %142 = vector.load %arg7[%c0_75, %c0_76] : memref<1x64xf32, #tpu.memory_space<vmem>>, vector<1x64xf32>
      %143 = vector.broadcast %142 : vector<1x64xf32> to vector<16x64xf32>
      %144 = arith.addf %141, %143 : vector<16x64xf32>
      %145 = arith.truncf %144 : vector<16x64xf32> to vector<16x64xbf16>
      %146 = vector.extract_strided_slice %145 {offsets = [0, 0], sizes = [16, 8], strides = [1, 1]} : vector<16x64xbf16> to vector<16x8xbf16>
      %c0_77 = arith.constant 0 : index
      %c0_78 = arith.constant 0 : index
      %c0_79 = arith.constant 0 : index
      %147 = vector.load %arg15[%c0_77, %c0_78, %c0_79] : memref<4x16x8xbf16, #tpu.memory_space<vmem>>, vector<1x16x8xbf16>
      %148 = vector.shape_cast %147 : vector<1x16x8xbf16> to vector<16x8xbf16>
      %149 = vector.shape_cast %146 : vector<16x8xbf16> to vector<1x16x8xbf16>
      tpu.vector_store %arg15[%c0_77, %c0_78, %c0_79], %149 {strides = array<i32>} : memref<4x16x8xbf16, #tpu.memory_space<vmem>>, vector<1x16x8xbf16>,
      %150 = vector.extract_strided_slice %145 {offsets = [0, 32], sizes = [16, 8], strides = [1, 1]} : vector<16x64xbf16> to vector<16x8xbf16>
      %c0_80 = arith.constant 0 : index
      %c0_81 = arith.constant 0 : index
      %c0_82 = arith.constant 0 : index
      %151 = vector.load %arg16[%c0_80, %c0_81, %c0_82] : memref<4x16x8xbf16, #tpu.memory_space<vmem>>, vector<1x16x8xbf16>
      %152 = vector.shape_cast %151 : vector<1x16x8xbf16> to vector<16x8xbf16>
      %153 = vector.shape_cast %150 : vector<16x8xbf16> to vector<1x16x8xbf16>
      tpu.vector_store %arg16[%c0_80, %c0_81, %c0_82], %153 {strides = array<i32>} : memref<4x16x8xbf16, #tpu.memory_space<vmem>>, vector<1x16x8xbf16>,
      %154 = vector.extract_strided_slice %145 {offsets = [0, 8], sizes = [16, 8], strides = [1, 1]} : vector<16x64xbf16> to vector<16x8xbf16>
      %c1_83 = arith.constant 1 : index
      %c0_84 = arith.constant 0 : index
      %c0_85 = arith.constant 0 : index
      %155 = vector.load %arg15[%c1_83, %c0_84, %c0_85] : memref<4x16x8xbf16, #tpu.memory_space<vmem>>, vector<1x16x8xbf16>
      %156 = vector.shape_cast %155 : vector<1x16x8xbf16> to vector<16x8xbf16>
      %157 = vector.shape_cast %154 : vector<16x8xbf16> to vector<1x16x8xbf16>
      tpu.vector_store %arg15[%c1_83, %c0_84, %c0_85], %157 {strides = array<i32>} : memref<4x16x8xbf16, #tpu.memory_space<vmem>>, vector<1x16x8xbf16>,
      %158 = vector.extract_strided_slice %145 {offsets = [0, 40], sizes = [16, 8], strides = [1, 1]} : vector<16x64xbf16> to vector<16x8xbf16>
      %c1_86 = arith.constant 1 : index
      %c0_87 = arith.constant 0 : index
      %c0_88 = arith.constant 0 : index
      %159 = vector.load %arg16[%c1_86, %c0_87, %c0_88] : memref<4x16x8xbf16, #tpu.memory_space<vmem>>, vector<1x16x8xbf16>
      %160 = vector.shape_cast %159 : vector<1x16x8xbf16> to vector<16x8xbf16>
      %161 = vector.shape_cast %158 : vector<16x8xbf16> to vector<1x16x8xbf16>
      tpu.vector_store %arg16[%c1_86, %c0_87, %c0_88], %161 {strides = array<i32>} : memref<4x16x8xbf16, #tpu.memory_space<vmem>>, vector<1x16x8xbf16>,
      %162 = vector.extract_strided_slice %145 {offsets = [0, 16], sizes = [16, 8], strides = [1, 1]} : vector<16x64xbf16> to vector<16x8xbf16>
      %c2_89 = arith.constant 2 : index
      %c0_90 = arith.constant 0 : index
      %c0_91 = arith.constant 0 : index
      %163 = vector.load %arg15[%c2_89, %c0_90, %c0_91] : memref<4x16x8xbf16, #tpu.memory_space<vmem>>, vector<1x16x8xbf16>
      %164 = vector.shape_cast %163 : vector<1x16x8xbf16> to vector<16x8xbf16>
      %165 = vector.shape_cast %162 : vector<16x8xbf16> to vector<1x16x8xbf16>
      tpu.vector_store %arg15[%c2_89, %c0_90, %c0_91], %165 {strides = array<i32>} : memref<4x16x8xbf16, #tpu.memory_space<vmem>>, vector<1x16x8xbf16>,
      %166 = vector.extract_strided_slice %145 {offsets = [0, 48], sizes = [16, 8], strides = [1, 1]} : vector<16x64xbf16> to vector<16x8xbf16>
      %c2_92 = arith.constant 2 : index
      %c0_93 = arith.constant 0 : index
      %c0_94 = arith.constant 0 : index
      %167 = vector.load %arg16[%c2_92, %c0_93, %c0_94] : memref<4x16x8xbf16, #tpu.memory_space<vmem>>, vector<1x16x8xbf16>
      %168 = vector.shape_cast %167 : vector<1x16x8xbf16> to vector<16x8xbf16>
      %169 = vector.shape_cast %166 : vector<16x8xbf16> to vector<1x16x8xbf16>
      tpu.vector_store %arg16[%c2_92, %c0_93, %c0_94], %169 {strides = array<i32>} : memref<4x16x8xbf16, #tpu.memory_space<vmem>>, vector<1x16x8xbf16>,
      %170 = vector.extract_strided_slice %145 {offsets = [0, 24], sizes = [16, 8], strides = [1, 1]} : vector<16x64xbf16> to vector<16x8xbf16>
      %c3_95 = arith.constant 3 : index
      %c0_96 = arith.constant 0 : index
      %c0_97 = arith.constant 0 : index
      %171 = vector.load %arg15[%c3_95, %c0_96, %c0_97] : memref<4x16x8xbf16, #tpu.memory_space<vmem>>, vector<1x16x8xbf16>
      %172 = vector.shape_cast %171 : vector<1x16x8xbf16> to vector<16x8xbf16>
      %173 = vector.shape_cast %170 : vector<16x8xbf16> to vector<1x16x8xbf16>
      tpu.vector_store %arg15[%c3_95, %c0_96, %c0_97], %173 {strides = array<i32>} : memref<4x16x8xbf16, #tpu.memory_space<vmem>>, vector<1x16x8xbf16>,
      %174 = vector.extract_strided_slice %145 {offsets = [0, 56], sizes = [16, 8], strides = [1, 1]} : vector<16x64xbf16> to vector<16x8xbf16>
      %c3_98 = arith.constant 3 : index
      %c0_99 = arith.constant 0 : index
      %c0_100 = arith.constant 0 : index
      %175 = vector.load %arg16[%c3_98, %c0_99, %c0_100] : memref<4x16x8xbf16, #tpu.memory_space<vmem>>, vector<1x16x8xbf16>
      %176 = vector.shape_cast %175 : vector<1x16x8xbf16> to vector<16x8xbf16>
      %177 = vector.shape_cast %174 : vector<16x8xbf16> to vector<1x16x8xbf16>
      tpu.vector_store %arg16[%c3_98, %c0_99, %c0_100], %177 {strides = array<i32>} : memref<4x16x8xbf16, #tpu.memory_space<vmem>>, vector<1x16x8xbf16>,
    } else {
    }
    %c0_7 = arith.constant 0 : index
    %c0_8 = arith.constant 0 : index
    %c0_9 = arith.constant 0 : index
    %9 = vector.load %arg2[%c0_7, %c0_8, %c0_9] : memref<1x8x32xf32, #tpu.memory_space<vmem>>, vector<1x8x32xf32>
    %10 = vector.shape_cast %9 : vector<1x8x32xf32> to vector<8x32xf32>
    %cst = arith.constant dense<0.000000e+00> : vector<8xf32>
    %11 = vector.multi_reduction <add>, %10, %cst [1] : vector<8x32xf32> to vector<8xf32>
    %12 = vector.shape_cast %11 : vector<8xf32> to vector<8x1xf32>
    %cst_10 = arith.constant 3.200000e+01 : f32
    %13 = vector.broadcast %cst_10 : f32 to vector<8x1xf32>
    %14 = arith.divf %12, %13 : vector<8x1xf32>
    %15 = vector.broadcast %14 : vector<8x1xf32> to vector<8x32xf32>
    %16 = arith.subf %10, %15 : vector<8x32xf32>
    %17 = arith.mulf %16, %16 : vector<8x32xf32>
    %cst_11 = arith.constant dense<0.000000e+00> : vector<8xf32>
    %18 = vector.multi_reduction <add>, %17, %cst_11 [1] : vector<8x32xf32> to vector<8xf32>
    %19 = vector.shape_cast %18 : vector<8xf32> to vector<8x1xf32>
    %cst_12 = arith.constant 3.200000e+01 : f32
    %20 = vector.broadcast %cst_12 : f32 to vector<8x1xf32>
    %21 = arith.divf %19, %20 : vector<8x1xf32>
    %22 = vector.broadcast %14 : vector<8x1xf32> to vector<8x32xf32>
    %23 = arith.subf %10, %22 : vector<8x32xf32>
    %cst_13 = arith.constant 9.99999974E-6 : f32
    %24 = vector.broadcast %cst_13 : f32 to vector<8x1xf32>
    %25 = arith.addf %21, %24 : vector<8x1xf32>
    %26 = math.rsqrt %25 : vector<8x1xf32>
    %27 = vector.broadcast %26 : vector<8x1xf32> to vector<8x32xf32>
    %28 = arith.mulf %23, %27 : vector<8x32xf32>
    %29 = vector.broadcast %0 : vector<1x32xf32> to vector<8x32xf32>
    %30 = arith.mulf %28, %29 : vector<8x32xf32>
    %31 = vector.broadcast %1 : vector<1x32xf32> to vector<8x32xf32>
    %32 = arith.addf %30, %31 : vector<8x32xf32>
    %33 = arith.truncf %32 : vector<8x32xf32> to vector<8x32xbf16>
    %c0_14 = arith.constant 0 : index
    %c0_15 = arith.constant 0 : index
    %34 = vector.load %arg4[%c0_14, %c0_15] : memref<32x32xbf16, #tpu.memory_space<vmem>>, vector<32x32xbf16>
    %cst_16 = arith.constant dense<0.000000e+00> : vector<8x32xf32>
    %35 = tpu.matmul %33, %34, %cst_16 {dimension_numbers = #tpu.dot_dimension_numbers<[1], [0], [0], [1], [0, 0, 1, 1], [], []>} : vector<8x32xbf16>, vector<32x32xbf16>, vector<8x32xf32> -> vector<8x32xf32>
    %c0_17 = arith.constant 0 : index
    %c0_18 = arith.constant 0 : index
    %36 = vector.load %arg5[%c0_17, %c0_18] : memref<1x32xf32, #tpu.memory_space<vmem>>, vector<1x32xf32>
    %37 = vector.broadcast %36 : vector<1x32xf32> to vector<8x32xf32>
    %38 = arith.addf %35, %37 : vector<8x32xf32>
    %39 = arith.truncf %38 : vector<8x32xf32> to vector<8x32xbf16>
    %40 = vector.extract_strided_slice %39 {offsets = [0, 0], sizes = [8, 8], strides = [1, 1]} : vector<8x32xbf16> to vector<8x8xbf16>
    %c0_19 = arith.constant 0 : index
    %c0_20 = arith.constant 0 : index
    %c0_21 = arith.constant 0 : index
    %41 = vector.load %arg17[%c0_19, %c0_20, %c0_21] : memref<4x8x8xbf16, #tpu.memory_space<vmem>>, vector<1x8x8xbf16>
    %42 = vector.shape_cast %41 : vector<1x8x8xbf16> to vector<8x8xbf16>
    %43 = vector.shape_cast %40 : vector<8x8xbf16> to vector<1x8x8xbf16>
    tpu.vector_store %arg17[%c0_19, %c0_20, %c0_21], %43 {strides = array<i32>} : memref<4x8x8xbf16, #tpu.memory_space<vmem>>, vector<1x8x8xbf16>,
    %44 = vector.extract_strided_slice %39 {offsets = [0, 8], sizes = [8, 8], strides = [1, 1]} : vector<8x32xbf16> to vector<8x8xbf16>
    %c1_22 = arith.constant 1 : index
    %c0_23 = arith.constant 0 : index
    %c0_24 = arith.constant 0 : index
    %45 = vector.load %arg17[%c1_22, %c0_23, %c0_24] : memref<4x8x8xbf16, #tpu.memory_space<vmem>>, vector<1x8x8xbf16>
    %46 = vector.shape_cast %45 : vector<1x8x8xbf16> to vector<8x8xbf16>
    %47 = vector.shape_cast %44 : vector<8x8xbf16> to vector<1x8x8xbf16>
    tpu.vector_store %arg17[%c1_22, %c0_23, %c0_24], %47 {strides = array<i32>} : memref<4x8x8xbf16, #tpu.memory_space<vmem>>, vector<1x8x8xbf16>,
    %48 = vector.extract_strided_slice %39 {offsets = [0, 16], sizes = [8, 8], strides = [1, 1]} : vector<8x32xbf16> to vector<8x8xbf16>
    %c2_25 = arith.constant 2 : index
    %c0_26 = arith.constant 0 : index
    %c0_27 = arith.constant 0 : index
    %49 = vector.load %arg17[%c2_25, %c0_26, %c0_27] : memref<4x8x8xbf16, #tpu.memory_space<vmem>>, vector<1x8x8xbf16>
    %50 = vector.shape_cast %49 : vector<1x8x8xbf16> to vector<8x8xbf16>
    %51 = vector.shape_cast %48 : vector<8x8xbf16> to vector<1x8x8xbf16>
    tpu.vector_store %arg17[%c2_25, %c0_26, %c0_27], %51 {strides = array<i32>} : memref<4x8x8xbf16, #tpu.memory_space<vmem>>, vector<1x8x8xbf16>,
    %52 = vector.extract_strided_slice %39 {offsets = [0, 24], sizes = [8, 8], strides = [1, 1]} : vector<8x32xbf16> to vector<8x8xbf16>
    %c3_28 = arith.constant 3 : index
    %c0_29 = arith.constant 0 : index
    %c0_30 = arith.constant 0 : index
    %53 = vector.load %arg17[%c3_28, %c0_29, %c0_30] : memref<4x8x8xbf16, #tpu.memory_space<vmem>>, vector<1x8x8xbf16>
    %54 = vector.shape_cast %53 : vector<1x8x8xbf16> to vector<8x8xbf16>
    %55 = vector.shape_cast %52 : vector<8x8xbf16> to vector<1x8x8xbf16>
    tpu.vector_store %arg17[%c3_28, %c0_29, %c0_30], %55 {strides = array<i32>} : memref<4x8x8xbf16, #tpu.memory_space<vmem>>, vector<1x8x8xbf16>,
    %cst_31 = arith.constant 0.000000e+00 : f32
    %56 = vector.broadcast %cst_31 : f32 to vector<8x16xf32>
    %c0_32 = arith.constant 0 : index
    %c0_33 = arith.constant 0 : index
    %57 = vector.load %arg20[%c0_32, %c0_33] : memref<8x16xf32, #tpu.memory_space<vmem>>, vector<8x16xf32>
    tpu.vector_store %arg20[%c0_32, %c0_33], %56 {strides = array<i32>} : memref<8x16xf32, #tpu.memory_space<vmem>>, vector<8x16xf32>,
    %cst_34 = arith.constant 0.000000e+00 : f32
    %58 = vector.broadcast %cst_34 : f32 to vector<8x32xf32>
    %c0_35 = arith.constant 0 : index
    %c0_36 = arith.constant 0 : index
    %59 = vector.load %arg21[%c0_35, %c0_36] : memref<8x32xf32, #tpu.memory_space<vmem>>, vector<8x32xf32>
    tpu.vector_store %arg21[%c0_35, %c0_36], %58 {strides = array<i32>} : memref<8x32xf32, #tpu.memory_space<vmem>>, vector<8x32xf32>,
    %c8_i32 = arith.constant 8 : i32
    %60 = arith.muli %arg1, %c8_i32 : i32
    %61 = tpu.iota {dimensions = array<i32: 0>} : vector<8x8xi32>
    %62 = vector.broadcast %60 : i32 to vector<8x8xi32>
    %63 = arith.addi %62, %61 : vector<8x8xi32>
    %c0_i32_37 = arith.constant 0 : i32
    %c2_i32 = arith.constant 2 : i32
    %64 = arith.addi %c0_i32_37, %c2_i32 : i32
    %c1_i32 = arith.constant 1 : i32
    scf.for %arg22 = %c0_i32_37 to %64 step %c1_i32  : i32 {
      %c2_i32_64 = arith.constant 2 : i32
      %115 = arith.muli %arg22, %c2_i32_64 : i32
      %116 = tpu.assume_multiple %115, 2 : i32
      %117 = arith.index_cast %116 : i32 to index
      %c0_65 = arith.constant 0 : index
      %c0_66 = arith.constant 0 : index
      %118 = vector.load %arg17[%117, %c0_65, %c0_66] : memref<4x8x8xbf16, #tpu.memory_space<vmem>>, vector<2x8x8xbf16>
      %cst_67 = arith.constant -1.000000e+30 : f32
      %119 = vector.broadcast %cst_67 : f32 to vector<2x8x16xf32>
      %c0_68 = arith.constant 0 : index
      %c0_69 = arith.constant 0 : index
      %c0_70 = arith.constant 0 : index
      %120 = vector.load %arg18[%c0_68, %c0_69, %c0_70] : memref<2x8x16xf32, #tpu.memory_space<vmem>>, vector<2x8x16xf32>
      tpu.vector_store %arg18[%c0_68, %c0_69, %c0_70], %119 {strides = array<i32>} : memref<2x8x16xf32, #tpu.memory_space<vmem>>, vector<2x8x16xf32>,
      %c0_i32_71 = arith.constant 0 : i32
      %121 = arith.cmpi sge, %arg1, %c0_i32_71 : i32
      %122 = arith.extui %121 : i1 to i32
      %c0_i32_72 = arith.constant 0 : i32
      %123 = arith.cmpi ne, %122, %c0_i32_72 : i32
      scf.if %123 {
        %161 = arith.index_cast %116 : i32 to index
        %c0_105 = arith.constant 0 : index
        %c0_106 = arith.constant 0 : index
        %162 = vector.load %arg15[%161, %c0_105, %c0_106] : memref<4x16x8xbf16, #tpu.memory_space<vmem>>, vector<2x8x8xbf16>
        "tpu.trace_start"() <{level = 10 : i32, message = "hqd,hkd->hqk"}> : () -> ()
        %cst_107 = arith.constant dense<0.000000e+00> : vector<2x8x8xf32>
        %163 = tpu.matmul %118, %162, %cst_107 {dimension_numbers = #tpu.dot_dimension_numbers<[2], [2], [1], [1], [0, 0, 0, 1, 1, 1], [0], [0]>} : vector<2x8x8xbf16>, vector<2x8x8xbf16>, vector<2x8x8xf32> -> vector<2x8x8xf32>
        "tpu.trace_stop"() : () -> ()
        %164 = tpu.iota {dimensions = array<i32: 1>} : vector<8x8xi32>
        %c0_i32_108 = arith.constant 0 : i32
        %165 = vector.broadcast %c0_i32_108 : i32 to vector<8x8xi32>
        %166 = arith.addi %165, %164 : vector<8x8xi32>
        %167 = arith.cmpi sge, %63, %166 : vector<8x8xi32>
        %168 = vector.shape_cast %167 : vector<8x8xi1> to vector<1x8x8xi1>
        %cst_109 = arith.constant -1.000000e+30 : f32
        %169 = vector.shape_cast %168 : vector<1x8x8xi1> to vector<1x8x8xi1>
        %170 = vector.broadcast %169 : vector<1x8x8xi1> to vector<2x8x8xi1>
        %171 = vector.broadcast %cst_109 : f32 to vector<2x8x8xf32>
        %172 = arith.select %170, %163, %171 : vector<2x8x8xi1>, vector<2x8x8xf32>
        %c0_110 = arith.constant 0 : index
        %c0_111 = arith.constant 0 : index
        %c0_112 = arith.constant 0 : index
        %173 = vector.load %arg18[%c0_110, %c0_111, %c0_112] : memref<2x8x16xf32, #tpu.memory_space<vmem>>, vector<2x8x8xf32>
        tpu.vector_store %arg18[%c0_110, %c0_111, %c0_112], %172 {strides = array<i32>} : memref<2x8x16xf32, #tpu.memory_space<vmem>>, vector<2x8x8xf32>,
      } else {
      }
      %c1_i32_73 = arith.constant 1 : i32
      %124 = arith.cmpi sge, %arg1, %c1_i32_73 : i32
      %125 = arith.extui %124 : i1 to i32
      %c0_i32_74 = arith.constant 0 : i32
      %126 = arith.cmpi ne, %125, %c0_i32_74 : i32
      scf.if %126 {
        %161 = arith.index_cast %116 : i32 to index
        %c8 = arith.constant 8 : index
        %c0_105 = arith.constant 0 : index
        %162 = vector.load %arg15[%161, %c8, %c0_105] : memref<4x16x8xbf16, #tpu.memory_space<vmem>>, vector<2x8x8xbf16>
        "tpu.trace_start"() <{level = 10 : i32, message = "hqd,hkd->hqk"}> : () -> ()
        %cst_106 = arith.constant dense<0.000000e+00> : vector<2x8x8xf32>
        %163 = tpu.matmul %118, %162, %cst_106 {dimension_numbers = #tpu.dot_dimension_numbers<[2], [2], [1], [1], [0, 0, 0, 1, 1, 1], [0], [0]>} : vector<2x8x8xbf16>, vector<2x8x8xbf16>, vector<2x8x8xf32> -> vector<2x8x8xf32>
        "tpu.trace_stop"() : () -> ()
        %164 = tpu.iota {dimensions = array<i32: 1>} : vector<8x8xi32>
        %c8_i32_107 = arith.constant 8 : i32
        %165 = vector.broadcast %c8_i32_107 : i32 to vector<8x8xi32>
        %166 = arith.addi %165, %164 : vector<8x8xi32>
        %167 = arith.cmpi sge, %63, %166 : vector<8x8xi32>
        %168 = vector.shape_cast %167 : vector<8x8xi1> to vector<1x8x8xi1>
        %cst_108 = arith.constant -1.000000e+30 : f32
        %169 = vector.shape_cast %168 : vector<1x8x8xi1> to vector<1x8x8xi1>
        %170 = vector.broadcast %169 : vector<1x8x8xi1> to vector<2x8x8xi1>
        %171 = vector.broadcast %cst_108 : f32 to vector<2x8x8xf32>
        %172 = arith.select %170, %163, %171 : vector<2x8x8xi1>, vector<2x8x8xf32>
        %c0_109 = arith.constant 0 : index
        %c0_110 = arith.constant 0 : index
        %c8_111 = arith.constant 8 : index
        %173 = vector.load %arg18[%c0_109, %c0_110, %c8_111] : memref<2x8x16xf32, #tpu.memory_space<vmem>>, vector<2x8x8xf32>
        tpu.vector_store %arg18[%c0_109, %c0_110, %c8_111], %172 {strides = array<i32>} : memref<2x8x16xf32, #tpu.memory_space<vmem>>, vector<2x8x8xf32>,
      } else {
      }
      %c0_75 = arith.constant 0 : index
      %c0_76 = arith.constant 0 : index
      %c0_77 = arith.constant 0 : index
      %127 = vector.load %arg18[%c0_75, %c0_76, %c0_77] : memref<2x8x16xf32, #tpu.memory_space<vmem>>, vector<2x8x16xf32>
      %cst_78 = arith.constant dense<0xFF800000> : vector<2x8xf32>
      %128 = vector.multi_reduction <maximumf>, %127, %cst_78 [2] : vector<2x8x16xf32> to vector<2x8xf32>
      %129 = vector.shape_cast %128 : vector<2x8xf32> to vector<2x8x1xf32>
      %130 = vector.broadcast %129 : vector<2x8x1xf32> to vector<2x8x16xf32>
      %131 = arith.subf %127, %130 : vector<2x8x16xf32>
      %132 = math.exp %131 : vector<2x8x16xf32>
      %cst_79 = arith.constant dense<0.000000e+00> : vector<2x8xf32>
      %133 = vector.multi_reduction <add>, %132, %cst_79 [2] : vector<2x8x16xf32> to vector<2x8xf32>
      %134 = vector.shape_cast %133 : vector<2x8xf32> to vector<2x8x1xf32>
      %cst_80 = arith.constant 1.000000e+00 : f32
      %135 = vector.broadcast %cst_80 : f32 to vector<2x8x1xf32>
      %136 = arith.divf %135, %134 : vector<2x8x1xf32>
      %137 = vector.broadcast %136 : vector<2x8x1xf32> to vector<2x8x16xf32>
      %138 = arith.mulf %132, %137 : vector<2x8x16xf32>
      %c0_81 = arith.constant 0 : index
      %c0_82 = arith.constant 0 : index
      %139 = vector.load %arg20[%c0_81, %c0_82] : memref<8x16xf32, #tpu.memory_space<vmem>>, vector<8x16xf32>
      %cst_83 = arith.constant dense<0.000000e+00> : vector<8x16xf32>
      %140 = vector.multi_reduction <add>, %138, %cst_83 [0] : vector<2x8x16xf32> to vector<8x16xf32>
      %141 = arith.addf %139, %140 : vector<8x16xf32>
      %c0_84 = arith.constant 0 : index
      %c0_85 = arith.constant 0 : index
      %142 = vector.load %arg20[%c0_84, %c0_85] : memref<8x16xf32, #tpu.memory_space<vmem>>, vector<8x16xf32>
      tpu.vector_store %arg20[%c0_84, %c0_85], %141 {strides = array<i32>} : memref<8x16xf32, #tpu.memory_space<vmem>>, vector<8x16xf32>,
      %cst_86 = arith.constant 0.000000e+00 : f32
      %143 = vector.broadcast %cst_86 : f32 to vector<2x8x8xf32>
      %c0_87 = arith.constant 0 : index
      %c0_88 = arith.constant 0 : index
      %c0_89 = arith.constant 0 : index
      %144 = vector.load %arg19[%c0_87, %c0_88, %c0_89] : memref<2x8x8xf32, #tpu.memory_space<vmem>>, vector<2x8x8xf32>
      tpu.vector_store %arg19[%c0_87, %c0_88, %c0_89], %143 {strides = array<i32>} : memref<2x8x8xf32, #tpu.memory_space<vmem>>, vector<2x8x8xf32>,
      %145 = arith.truncf %138 : vector<2x8x16xf32> to vector<2x8x16xbf16>
      %c0_i32_90 = arith.constant 0 : i32
      %146 = arith.cmpi sge, %arg1, %c0_i32_90 : i32
      %147 = arith.extui %146 : i1 to i32
      %c0_i32_91 = arith.constant 0 : i32
      %148 = arith.cmpi ne, %147, %c0_i32_91 : i32
      scf.if %148 {
        %161 = arith.index_cast %116 : i32 to index
        %c0_105 = arith.constant 0 : index
        %c0_106 = arith.constant 0 : index
        %162 = vector.load %arg16[%161, %c0_105, %c0_106] : memref<4x16x8xbf16, #tpu.memory_space<vmem>>, vector<2x8x8xbf16>
        %c0_107 = arith.constant 0 : index
        %c0_108 = arith.constant 0 : index
        %c0_109 = arith.constant 0 : index
        %163 = vector.load %arg19[%c0_107, %c0_108, %c0_109] : memref<2x8x8xf32, #tpu.memory_space<vmem>>, vector<2x8x8xf32>
        %164 = vector.extract_strided_slice %145 {offsets = [0, 0, 0], sizes = [2, 8, 8], strides = [1, 1, 1]} : vector<2x8x16xbf16> to vector<2x8x8xbf16>
        "tpu.trace_start"() <{level = 10 : i32, message = "hqk,hkd->hqd"}> : () -> ()
        %cst_110 = arith.constant dense<0.000000e+00> : vector<2x8x8xf32>
        %165 = tpu.matmul %164, %162, %cst_110 {dimension_numbers = #tpu.dot_dimension_numbers<[2], [1], [1], [2], [0, 0, 0, 1, 1, 2], [0], [0]>} : vector<2x8x8xbf16>, vector<2x8x8xbf16>, vector<2x8x8xf32> -> vector<2x8x8xf32>
        "tpu.trace_stop"() : () -> ()
        %166 = arith.addf %163, %165 : vector<2x8x8xf32>
        %c0_111 = arith.constant 0 : index
        %c0_112 = arith.constant 0 : index
        %c0_113 = arith.constant 0 : index
        %167 = vector.load %arg19[%c0_111, %c0_112, %c0_113] : memref<2x8x8xf32, #tpu.memory_space<vmem>>, vector<2x8x8xf32>
        tpu.vector_store %arg19[%c0_111, %c0_112, %c0_113], %166 {strides = array<i32>} : memref<2x8x8xf32, #tpu.memory_space<vmem>>, vector<2x8x8xf32>,
      } else {
      }
      %c1_i32_92 = arith.constant 1 : i32
      %149 = arith.cmpi sge, %arg1, %c1_i32_92 : i32
      %150 = arith.extui %149 : i1 to i32
      %c0_i32_93 = arith.constant 0 : i32
      %151 = arith.cmpi ne, %150, %c0_i32_93 : i32
      scf.if %151 {
        %161 = arith.index_cast %116 : i32 to index
        %c8 = arith.constant 8 : index
        %c0_105 = arith.constant 0 : index
        %162 = vector.load %arg16[%161, %c8, %c0_105] : memref<4x16x8xbf16, #tpu.memory_space<vmem>>, vector<2x8x8xbf16>
        %c0_106 = arith.constant 0 : index
        %c0_107 = arith.constant 0 : index
        %c0_108 = arith.constant 0 : index
        %163 = vector.load %arg19[%c0_106, %c0_107, %c0_108] : memref<2x8x8xf32, #tpu.memory_space<vmem>>, vector<2x8x8xf32>
        %164 = vector.extract_strided_slice %145 {offsets = [0, 0, 8], sizes = [2, 8, 8], strides = [1, 1, 1]} : vector<2x8x16xbf16> to vector<2x8x8xbf16>
        "tpu.trace_start"() <{level = 10 : i32, message = "hqk,hkd->hqd"}> : () -> ()
        %cst_109 = arith.constant dense<0.000000e+00> : vector<2x8x8xf32>
        %165 = tpu.matmul %164, %162, %cst_109 {dimension_numbers = #tpu.dot_dimension_numbers<[2], [1], [1], [2], [0, 0, 0, 1, 1, 2], [0], [0]>} : vector<2x8x8xbf16>, vector<2x8x8xbf16>, vector<2x8x8xf32> -> vector<2x8x8xf32>
        "tpu.trace_stop"() : () -> ()
        %166 = arith.addf %163, %165 : vector<2x8x8xf32>
        %c0_110 = arith.constant 0 : index
        %c0_111 = arith.constant 0 : index
        %c0_112 = arith.constant 0 : index
        %167 = vector.load %arg19[%c0_110, %c0_111, %c0_112] : memref<2x8x8xf32, #tpu.memory_space<vmem>>, vector<2x8x8xf32>
        tpu.vector_store %arg19[%c0_110, %c0_111, %c0_112], %166 {strides = array<i32>} : memref<2x8x8xf32, #tpu.memory_space<vmem>>, vector<2x8x8xf32>,
      } else {
      }
      %c0_94 = arith.constant 0 : index
      %c0_95 = arith.constant 0 : index
      %c0_96 = arith.constant 0 : index
      %152 = vector.load %arg19[%c0_94, %c0_95, %c0_96] : memref<2x8x8xf32, #tpu.memory_space<vmem>>, vector<2x8x8xf32>
      %153 = arith.truncf %152 : vector<2x8x8xf32> to vector<2x8x8xbf16>
      %154 = arith.index_cast %116 : i32 to index
      %c0_97 = arith.constant 0 : index
      %c0_98 = arith.constant 0 : index
      %155 = vector.load %arg8[%154, %c0_97, %c0_98] : memref<4x8x32xbf16, #tpu.memory_space<vmem>>, vector<2x8x32xbf16>
      "tpu.trace_start"() <{level = 10 : i32, message = "hqd,hde->hqe"}> : () -> ()
      %cst_99 = arith.constant dense<0.000000e+00> : vector<2x8x32xf32>
      %156 = tpu.matmul %153, %155, %cst_99 {dimension_numbers = #tpu.dot_dimension_numbers<[2], [1], [1], [2], [0, 0, 0, 1, 1, 2], [0], [0]>} : vector<2x8x8xbf16>, vector<2x8x32xbf16>, vector<2x8x32xf32> -> vector<2x8x32xf32>
      "tpu.trace_stop"() : () -> ()
      %c0_100 = arith.constant 0 : index
      %c0_101 = arith.constant 0 : index
      %157 = vector.load %arg21[%c0_100, %c0_101] : memref<8x32xf32, #tpu.memory_space<vmem>>, vector<8x32xf32>
      %cst_102 = arith.constant dense<0.000000e+00> : vector<8x32xf32>
      %158 = vector.multi_reduction <add>, %156, %cst_102 [0] : vector<2x8x32xf32> to vector<8x32xf32>
      %159 = arith.addf %157, %158 : vector<8x32xf32>
      %c0_103 = arith.constant 0 : index
      %c0_104 = arith.constant 0 : index
      %160 = vector.load %arg21[%c0_103, %c0_104] : memref<8x32xf32, #tpu.memory_space<vmem>>, vector<8x32xf32>
      tpu.vector_store %arg21[%c0_103, %c0_104], %159 {strides = array<i32>} : memref<8x32xf32, #tpu.memory_space<vmem>>, vector<8x32xf32>,
    }
    %c2_i32_38 = arith.constant 2 : i32
    %c0_39 = arith.constant 0 : index
    %c0_40 = arith.constant 0 : index
    %65 = vector.load %arg20[%c0_39, %c0_40] : memref<8x16xf32, #tpu.memory_space<vmem>>, vector<8x16xf32>
    %cst_41 = arith.constant 2.500000e-01 : f32
    %66 = vector.broadcast %cst_41 : f32 to vector<8x16xf32>
    %67 = arith.mulf %65, %66 : vector<8x16xf32>
    %68 = arith.truncf %67 : vector<8x16xf32> to vector<8x16xbf16>
    %c0_42 = arith.constant 0 : index
    %c0_43 = arith.constant 0 : index
    %c0_44 = arith.constant 0 : index
    %69 = vector.load %arg14[%c0_42, %c0_43, %c0_44] : memref<1x8x16xbf16, #tpu.memory_space<vmem>>, vector<1x8x16xbf16>
    %70 = vector.shape_cast %69 : vector<1x8x16xbf16> to vector<8x16xbf16>
    %71 = vector.shape_cast %68 : vector<8x16xbf16> to vector<1x8x16xbf16>
    tpu.vector_store %arg14[%c0_42, %c0_43, %c0_44], %71 {strides = array<i32>} : memref<1x8x16xbf16, #tpu.memory_space<vmem>>, vector<1x8x16xbf16>,
    %c0_45 = arith.constant 0 : index
    %c0_46 = arith.constant 0 : index
    %72 = vector.load %arg21[%c0_45, %c0_46] : memref<8x32xf32, #tpu.memory_space<vmem>>, vector<8x32xf32>
    %73 = arith.addf %10, %72 : vector<8x32xf32>
    %74 = vector.broadcast %4 : vector<1x32xf32> to vector<8x32xf32>
    %75 = arith.addf %73, %74 : vector<8x32xf32>
    %cst_47 = arith.constant dense<0.000000e+00> : vector<8xf32>
    %76 = vector.multi_reduction <add>, %75, %cst_47 [1] : vector<8x32xf32> to vector<8xf32>
    %77 = vector.shape_cast %76 : vector<8xf32> to vector<8x1xf32>
    %cst_48 = arith.constant 3.200000e+01 : f32
    %78 = vector.broadcast %cst_48 : f32 to vector<8x1xf32>
    %79 = arith.divf %77, %78 : vector<8x1xf32>
    %80 = vector.broadcast %79 : vector<8x1xf32> to vector<8x32xf32>
    %81 = arith.subf %75, %80 : vector<8x32xf32>
    %82 = arith.mulf %81, %81 : vector<8x32xf32>
    %cst_49 = arith.constant dense<0.000000e+00> : vector<8xf32>
    %83 = vector.multi_reduction <add>, %82, %cst_49 [1] : vector<8x32xf32> to vector<8xf32>
    %84 = vector.shape_cast %83 : vector<8xf32> to vector<8x1xf32>
    %cst_50 = arith.constant 3.200000e+01 : f32
    %85 = vector.broadcast %cst_50 : f32 to vector<8x1xf32>
    %86 = arith.divf %84, %85 : vector<8x1xf32>
    %87 = vector.broadcast %79 : vector<8x1xf32> to vector<8x32xf32>
    %88 = arith.subf %75, %87 : vector<8x32xf32>
    %cst_51 = arith.constant 9.99999974E-6 : f32
    %89 = vector.broadcast %cst_51 : f32 to vector<8x1xf32>
    %90 = arith.addf %86, %89 : vector<8x1xf32>
    %91 = math.rsqrt %90 : vector<8x1xf32>
    %92 = vector.broadcast %91 : vector<8x1xf32> to vector<8x32xf32>
    %93 = arith.mulf %88, %92 : vector<8x32xf32>
    %94 = vector.broadcast %2 : vector<1x32xf32> to vector<8x32xf32>
    %95 = arith.mulf %93, %94 : vector<8x32xf32>
    %96 = vector.broadcast %3 : vector<1x32xf32> to vector<8x32xf32>
    %97 = arith.addf %95, %96 : vector<8x32xf32>
    %98 = arith.truncf %97 : vector<8x32xf32> to vector<8x32xbf16>
    %c0_52 = arith.constant 0 : index
    %c0_53 = arith.constant 0 : index
    %99 = vector.load %arg9[%c0_52, %c0_53] : memref<32x64xbf16, #tpu.memory_space<vmem>>, vector<32x64xbf16>
    %cst_54 = arith.constant dense<0.000000e+00> : vector<8x64xf32>
    %100 = tpu.matmul %98, %99, %cst_54 {dimension_numbers = #tpu.dot_dimension_numbers<[1], [0], [0], [1], [0, 0, 1, 1], [], []>} : vector<8x32xbf16>, vector<32x64xbf16>, vector<8x64xf32> -> vector<8x64xf32>
    %c0_55 = arith.constant 0 : index
    %c0_56 = arith.constant 0 : index
    %101 = vector.load %arg10[%c0_55, %c0_56] : memref<1x64xf32, #tpu.memory_space<vmem>>, vector<1x64xf32>
    %102 = vector.broadcast %101 : vector<1x64xf32> to vector<8x64xf32>
    %103 = arith.addf %100, %102 : vector<8x64xf32>
    %cst_57 = arith.constant 0.000000e+00 : f32
    %104 = vector.broadcast %cst_57 : f32 to vector<8x64xf32>
    %105 = arith.maximumf %103, %104 : vector<8x64xf32>
    %106 = arith.truncf %105 : vector<8x64xf32> to vector<8x64xbf16>
    %c0_58 = arith.constant 0 : index
    %c0_59 = arith.constant 0 : index
    %107 = vector.load %arg11[%c0_58, %c0_59] : memref<64x32xbf16, #tpu.memory_space<vmem>>, vector<64x32xbf16>
    %cst_60 = arith.constant dense<0.000000e+00> : vector<8x32xf32>
    %108 = tpu.matmul %106, %107, %cst_60 {dimension_numbers = #tpu.dot_dimension_numbers<[1], [0], [0], [1], [0, 0, 1, 1], [], []>} : vector<8x64xbf16>, vector<64x32xbf16>, vector<8x32xf32> -> vector<8x32xf32>
    %109 = vector.broadcast %5 : vector<1x32xf32> to vector<8x32xf32>
    %110 = arith.addf %108, %109 : vector<8x32xf32>
    %111 = arith.addf %75, %110 : vector<8x32xf32>
    %c0_61 = arith.constant 0 : index
    %c0_62 = arith.constant 0 : index
    %c0_63 = arith.constant 0 : index
    %112 = vector.load %arg13[%c0_61, %c0_62, %c0_63] : memref<1x8x32xf32, #tpu.memory_space<vmem>>, vector<1x8x32xf32>
    %113 = vector.shape_cast %112 : vector<1x8x32xf32> to vector<8x32xf32>
    %114 = vector.shape_cast %111 : vector<8x32xf32> to vector<1x8x32xf32>
    tpu.vector_store %arg13[%c0_61, %c0_62, %c0_63], %114 {strides = array<i32>} : memref<1x8x32xf32, #tpu.memory_space<vmem>>, vector<1x8x32xf32>,
    return
  }
  func.func @transform_0(%arg0: i32, %arg1: i32) -> (i32, i32, i32) {
    %c0_i32 = arith.constant 0 : i32
    %c0_i32_0 = arith.constant 0 : i32
    return %arg0, %arg1, %c0_i32 : i32, i32, i32
  }
  func.func @transform_1(%arg0: i32, %arg1: i32) -> (i32, i32, i32) {
    %c0_i32 = arith.constant 0 : i32
    %c0_i32_0 = arith.constant 0 : i32
    %c0_i32_1 = arith.constant 0 : i32
    return %arg0, %c0_i32, %c0_i32_0 : i32, i32, i32
  }
  func.func @transform_2(%arg0: i32, %arg1: i32) -> (i32, i32) {
    %c0_i32 = arith.constant 0 : i32
    %c0_i32_0 = arith.constant 0 : i32
    %c0_i32_1 = arith.constant 0 : i32
    return %c0_i32, %c0_i32_0 : i32, i32
  }
  func.func @transform_3(%arg0: i32, %arg1: i32) -> (i32, i32) {
    %c0_i32 = arith.constant 0 : i32
    %c0_i32_0 = arith.constant 0 : i32
    %c0_i32_1 = arith.constant 0 : i32
    return %c0_i32, %c0_i32_0 : i32, i32
  }
  func.func @transform_4(%arg0: i32, %arg1: i32) -> (i32, i32) {
    %c0_i32 = arith.constant 0 : i32
    %c0_i32_0 = arith.constant 0 : i32
    %c0_i32_1 = arith.constant 0 : i32
    return %c0_i32, %c0_i32_0 : i32, i32
  }
  func.func @transform_5(%arg0: i32, %arg1: i32) -> (i32, i32) {
    %c0_i32 = arith.constant 0 : i32
    %c0_i32_0 = arith.constant 0 : i32
    %c0_i32_1 = arith.constant 0 : i32
    return %c0_i32, %c0_i32_0 : i32, i32
  }
  func.func @transform_6(%arg0: i32, %arg1: i32) -> (i32, i32, i32) {
    %c0_i32 = arith.constant 0 : i32
    %c0_i32_0 = arith.constant 0 : i32
    %c0_i32_1 = arith.constant 0 : i32
    %c0_i32_2 = arith.constant 0 : i32
    return %c0_i32, %c0_i32_0, %c0_i32_1 : i32, i32, i32
  }
  func.func @transform_7(%arg0: i32, %arg1: i32) -> (i32, i32) {
    %c0_i32 = arith.constant 0 : i32
    %c0_i32_0 = arith.constant 0 : i32
    %c0_i32_1 = arith.constant 0 : i32
    return %c0_i32, %c0_i32_0 : i32, i32
  }
  func.func @transform_8(%arg0: i32, %arg1: i32) -> (i32, i32) {
    %c0_i32 = arith.constant 0 : i32
    %c0_i32_0 = arith.constant 0 : i32
    %c0_i32_1 = arith.constant 0 : i32
    return %c0_i32, %c0_i32_0 : i32, i32
  }
  func.func @transform_9(%arg0: i32, %arg1: i32) -> (i32, i32) {
    %c0_i32 = arith.constant 0 : i32
    %c0_i32_0 = arith.constant 0 : i32
    %c0_i32_1 = arith.constant 0 : i32
    return %c0_i32, %c0_i32_0 : i32, i32
  }
  func.func @transform_10(%arg0: i32, %arg1: i32) -> (i32, i32) {
    %c0_i32 = arith.constant 0 : i32
    %c0_i32_0 = arith.constant 0 : i32
    %c0_i32_1 = arith.constant 0 : i32
    return %c0_i32, %c0_i32_0 : i32, i32
  }
  func.func @transform_11(%arg0: i32, %arg1: i32) -> (i32, i32, i32) {
    %c0_i32 = arith.constant 0 : i32
    %c0_i32_0 = arith.constant 0 : i32
    return %arg0, %arg1, %c0_i32 : i32, i32, i32
  }
  func.func @transform_12(%arg0: i32, %arg1: i32) -> (i32, i32, i32) {
    %c0_i32 = arith.constant 0 : i32
    %c0_i32_0 = arith.constant 0 : i32
    return %arg0, %arg1, %c0_i32 : i32, i32, i32
  }
}

</mosaic_0001>

<bundles_post_ra>
// kernel: tpu_custom_call.1
= control target key start
LH: loop header
LB: loop body
LE: loop exit
PB: predicated region body
PF: predicated region fallthrough
CT: control target
= control target key end

     0   :  { %s3431_s0 = inlined_call_operand.vmem [shape: f32[2,16,32], index: 0, kind: input, shape index: {}]   ;;  %s3432_s1 = inlined_call_operand.hbm [shape: f32[2,16,32], index: 1, kind: input, shape index: {}]   ;;  %s3433_s2 = inlined_call_operand.vmem [shape: bf16[32,32], index: 2, kind: input, shape index: {}]   ;;  %s3434_s3 = inlined_call_operand.hbm [shape: f32[1,32], index: 3, kind: input, shape index: {}]   ;;  %s3435_s4 = inlined_call_operand.hbm [shape: bf16[32,64], index: 4, kind: input, shape index: {}]   ;;  %s3436_s5 = inlined_call_operand.hbm [shape: f32[1,64], index: 5, kind: input, shape index: {}]   ;;  %s3437_s6 = inlined_call_operand.hbm [shape: bf16[4,8,32], index: 6, kind: input, shape index: {}]   ;;  %s3438_s7 = inlined_call_operand.hbm [shape: bf16[32,64], index: 7, kind: input, shape index: {}]   ;;  %s3439_s8 = inlined_call_operand.hbm [shape: f32[1,64], index: 8, kind: input, shape index: {}]   ;;  %s3440_s9 = inlined_call_operand.vmem [shape: bf16[64,32], index: 9, kind: input, shape index: {}]   ;;  %s3441_s10 = inlined_call_operand.hbm [shape: f32[6,32], index: 10, kind: input, shape index: {}]   ;;  %s3442_s11 = inlined_call_operand.hbm [shape: f32[2,16,32], index: 11, kind: output, shape index: {0}]   ;;  %s3443_s12 = inlined_call_operand.hbm [shape: bf16[2,16,16], index: 12, kind: output, shape index: {1}]  }
   0x1   :  { %3456 = sst [smem:[#allocation36_spill]] %s3431_s0 }
   0x2   :  { %3457 = sst [smem:[#allocation37_spill]] %s3432_s1 }
   0x3   :  { %3458 = sst [smem:[#allocation38_spill]] %s3433_s2 }
   0x4   :  { %3459 = sst [smem:[#allocation39_spill]] %s3434_s3 }
   0x5   :  { %3460 = sst [smem:[#allocation40_spill]] %s3435_s4 }
   0x6   :  { %3461 = sst [smem:[#allocation41_spill]] %s3436_s5 }
   0x7   :  { %3462 = sst [smem:[#allocation42_spill]] %s3437_s6 }
   0x8   :  { %3463 = sst [smem:[#allocation43_spill]] %s3438_s7 }
   0x9   :  { %3464 = sst [smem:[#allocation44_spill]] %s3439_s8 }
   0xa   :  { %3465 = sst [smem:[#allocation45_spill]] %s3440_s9 }
   0xb   :  { %3466 = sst [smem:[#allocation46_spill]] %s3441_s10 }
   0xc   :  { %3467 = sst [smem:[#allocation47_spill]] %s3442_s11 }
   0xd   :  { %3468 = sst [smem:[#allocation48_spill]] %s3443_s12 }
   0xe   :  { %18 = vsyncpa [#allocation10], 0 }
   0xf   :  { %20 = vsyncpa [#allocation10 + $0x1], 0 }
  0x10   :  { %21 = vsyncpa [#allocation13], 0 }
  0x11   :  { %22 = vsyncpa [#allocation16], 0 }
  0x12   :  { %23 = vsyncpa [#allocation19], 0 }
  0x13   :  { %24 = vsyncpa [#allocation22], 0 }
  0x14   :  { %25 = vsyncpa [#allocation11], 0 }
  0x15   :  { %27 = vsyncpa [#allocation11 + $0x1], 0 }
  0x16   :  { %28 = vsyncpa [#allocation25], 0 }
  0x17   :  { %30 = vsyncpa [#allocation25 + $0x1], 0  ;;  %s2915_s21 = smov 0   ;;  %s2917_s22 = smov 0  }
  0x18   :  { %s2919_s23 = smov 0   ;;  %s2921_s24 = smov 0  }
  0x19   :  { %s2923_s25 = smov 0   ;;  %s2925_s26 = smov 0  }
  0x1a   :  { %s2927_s27 = smov 0   ;;  %s2929_s28 = smov 0  }
  0x1b   :  { %s2931_s29 = smov 0   ;;  %s2933_s30 = smov 0  }
  0x1c   :  { %s2935_s13 = smov 0  }
  0x1d LB: > { %3469 = sst [smem:[#allocation33_spill]] %s2787_s27  ;;  %s3444_s14 = sadd.s32 4294967295, %s2803_s13   ;;  %s2803_s13 = sphi %s2935_s13, %s36_s13   ;;  %s2799_s30 = sphi %s2933_s30, %s3517_s30   ;;  %s2795_s29 = sphi %s2931_s29, %s3516_s29   ;;  %s2791_s28 = sphi %s2929_s28, %s3515_s28   ;;  %s2787_s27 = sphi %s2927_s27, %s3514_s27   ;;  %s2783_s26 = sphi %s2925_s26, %s3513_s26   ;;  %s2779_s25 = sphi %s2923_s25, %s3512_s25   ;;  %s2775_s24 = sphi %s2921_s24, %s3511_s24   ;;  %s2771_s23 = sphi %s2919_s23, %s3510_s23   ;;  %s2767_s22 = sphi %s2917_s22, %s3509_s22   ;;  %s2763_s21 = sphi %s2915_s21, %s3508_s21  }
  0x1e   : > { %p1952_p0 = scmp.ge.s32.totalorder %s2803_s13, 1  ;;  %p2974_p1 = scmp.eq.s32.totalorder %s3444_s14, 0 }
  0x1f   : > { %p352_p2 = scmp.lt.s32.totalorder %s2803_s13, 5  ;;  %s2809_s17 = smov [#allocation12]  }
  0x20   : > { %s3470_s15 = scalar_select %p2974_p1, 1, 0 }
  0x21   : > { %p2979_p3 = pnand %p1952_p0, %p352_p2  ;;  %s368_s18 = sshll.u32 %s2809_s17, 4  ;;  %s369_s18 = int_to_ptr.vmem [resolvable:$true] %s368_s18 }
  0x22   : > { %s2810_s19 = smov [#allocation15]   ;;  %s2811_s11 = smov [#allocation18]  }
  0x23   : > { %s3471_s16 = scalar_select %p2979_p3, 1, 0 }
  0x24   : > { %p2214_p4 = pneg %p2979_p3  ;;  %s392_s20 = sshll.u32 %s2810_s19, 4  ;;  %s393_s20 = int_to_ptr.vmem [resolvable:$true] %s392_s20 }
  0x25   : > { %s415_s12 = sshll.u32 %s2811_s11, 4  ;;  %s2434_s17 = scalar_lea.vmem %s369_s18, 16  ;;  %s416_s12 = int_to_ptr.vmem [resolvable:$true] %s415_s12 }
  0x26   : > { %p2987_p5 = pnand %p2214_p4, %p2974_p1  ;;  %p2435_p7 = scmp.ne.s32.totalorder %s369_s18, %s2434_s17 }
  0x27   : > { %s2441_s19 = scalar_lea.vmem %s369_s18, 32  ;;  %p2442_p10 = scmp.lt.s32.totalorder %s369_s18, %s369_s18 }
  0x28   : > { %p2993_p6 = pneg %p2987_p5  ;;  %p2443_p11 = scmp.lt.s32.totalorder %s2441_s19, %s2434_s17 }
  0x2a   : > { %p2437_p8 = pnand %p2435_p7, %p2993_p6  ;;  %p2444_p12 = por %p2443_p11, %p2442_p10 }
  0x2c   : > { %p2438_p9 = pneg %p2437_p8 }
  0x2e   : > { %p2445_p13 = pnand %p2444_p12, %p2438_p9 }
  0x30   : > { %2448 = shalt.err (!%p2445_p13)
}
  0x31   : > { %s3474_s3 = sld [smem:[#allocation39_spill]]  ;;  %s2460_s0 = scalar_lea.vmem %s393_s20, 16 }
  0x32   : > { %p2461_p0 = scmp.ne.s32.totalorder %s393_s20, %s2460_s0  ;;  %s2467_s27 = scalar_lea.vmem %s393_s20, 32 }
  0x33   : > { %p2468_p7 = scmp.lt.s32.totalorder %s393_s20, %s393_s20  ;;  %p2469_p8 = scmp.lt.s32.totalorder %s2467_s27, %s2460_s0 }
  0x34   : > { %p2463_p2 = pnand %p2461_p0, %p2993_p6 }
  0x35   : > { %p2470_p3 = por %p2469_p8, %p2468_p7 }
  0x36   : > { %p2464_p4 = pneg %p2463_p2 }
  0x37   : > { %2217 = dma.hbm_to_vmem [thread:$0]  (!%p2987_p5), %s3474_s3, 16, %s369_s18, [#allocation13]  }
  0x38   : > { %p2471_p1 = pnand %p2470_p3, %p2464_p4 }
  0x3a   : > { %2474 = shalt.err (!%p2471_p1)
}
  0x3b   : > { %s3475_s5 = sld [smem:[#allocation41_spill]]  ;;  %s2486_s2 = scalar_lea.vmem %s416_s12, 256 }
  0x3c   : > { %p2487_p9 = scmp.ne.s32.totalorder %s416_s12, %s2486_s2  ;;  %p2494_p12 = scmp.lt.s32.totalorder %s416_s12, %s416_s12 }
  0x3d   : > { %p2495_p13 = scmp.lt.s32.totalorder %s2486_s2, %s2486_s2 }
  0x3e   : > { %p2489_p10 = pnand %p2487_p9, %p2993_p6 }
  0x3f   : > { %p2496_p0 = por %p2495_p13, %p2494_p12 }
  0x40   : > { %p2490_p11 = pneg %p2489_p10 }
  0x41   : > { %2223 = dma.hbm_to_vmem [thread:$0]  (!%p2987_p5), %s3475_s5, 16, %s393_s20, [#allocation16]  }
  0x42   : > { %p2497_p2 = pnand %p2496_p0, %p2490_p11 }
  0x44   : > { %2500 = shalt.err (!%p2497_p2)
}
  0x45   : > { %s2812_s0 = smov 64   ;;  %s2813_s27 = smov 4  }
  0x46   : > { %s3476_s7 = sld [smem:[#allocation43_spill]]  ;;  %s2814_s11 = smov [#allocation14]  }
  0x47   : > { %s378_s17 = sshll.u32 %s2814_s11, 4  ;;  %s2815_s19 = smov [#allocation17]   ;;  %s379_s17 = int_to_ptr.vmem [resolvable:$true] %s378_s17 }
  0x48   : > { %s402_s2 = sshll.u32 %s2815_s19, 4  ;;  %s2512_s3 = scalar_lea.vmem %s379_s17, 256  ;;  %s403_s2 = int_to_ptr.vmem [resolvable:$true] %s402_s2 }
  0x49   : > { %p2513_p1 = scmp.ne.s32.totalorder %s379_s17, %s2512_s3  ;;  %p2520_p7 = scmp.lt.s32.totalorder %s379_s17, %s379_s17 }
  0x4a   : > { %p2521_p8 = scmp.lt.s32.totalorder %s2512_s3, %s2512_s3 }
  0x4b   : > { %p2515_p3 = pnand %p2513_p1, %p2993_p6 }
  0x4c   : > { %2229 = dma.hbm_to_vmem [thread:$0]  (!%p2987_p5), %s3476_s7, 256, %s416_s12, [#allocation19], %s2812_s0, %s2812_s0, %s2813_s27  }
  0x4d   : > { %p2516_p4 = pneg %p2515_p3  ;;  %p2522_p9 = por %p2521_p8, %p2520_p7 }
  0x4f   : > { %p2523_p10 = pnand %p2522_p9, %p2516_p4 }
  0x51   : > { %2526 = shalt.err (!%p2523_p10)
}
  0x52   : > { %s3477_s4 = sld [smem:[#allocation40_spill]]  ;;  %s2538_s20 = scalar_lea.vmem %s403_s2, 256 }
  0x53   : > { %p2539_p11 = scmp.ne.s32.totalorder %s403_s2, %s2538_s20  ;;  %p2546_p0 = scmp.lt.s32.totalorder %s403_s2, %s403_s2 }
  0x54   : > { %p2547_p2 = scmp.lt.s32.totalorder %s2538_s20, %s2538_s20 }
  0x55   : > { %p2541_p12 = pnand %p2539_p11, %p2993_p6 }
  0x56   : > { %p2548_p1 = por %p2547_p2, %p2546_p0 }
  0x57   : > { %p2542_p13 = pneg %p2541_p12 }
  0x58   : > { %2220 = dma.hbm_to_vmem [thread:$0]  (!%p2987_p5), %s3477_s4, 256, %s379_s17, [#allocation13], %s2812_s0, %s2812_s0, %s2813_s27  }
  0x59   : > { %p2549_p3 = pnand %p2548_p1, %p2542_p13 }
  0x5b   : > { %2552 = shalt.err (!%p2549_p3)
}
  0x5c   : > { %s3478_s6 = sld [smem:[#allocation42_spill]]  ;;  %s2816_s17 = smov [#allocation20]  }
  0x5d   : > { %s429_s19 = sshll.u32 %s2816_s17, 4  ;;  %s2817_s12 = smov [#allocation21]   ;;  %s430_s19 = int_to_ptr.vmem [resolvable:$true] %s429_s19 }
  0x5e   : > { %s443_s18 = sshll.u32 %s2817_s12, 4  ;;  %s2564_s4 = scalar_lea.vmem %s430_s19, 16  ;;  %s444_s18 = int_to_ptr.vmem [resolvable:$true] %s443_s18 }
  0x5f   : > { %p2565_p4 = scmp.ne.s32.totalorder %s430_s19, %s2564_s4  ;;  %s2571_s20 = scalar_lea.vmem %s430_s19, 32 }
  0x60   : > { %p2572_p9 = scmp.lt.s32.totalorder %s430_s19, %s430_s19  ;;  %p2573_p10 = scmp.lt.s32.totalorder %s2571_s20, %s2564_s4 }
  0x61   : > { %p2567_p7 = pnand %p2565_p4, %p2993_p6 }
  0x62   : > { %2226 = dma.hbm_to_vmem [thread:$0]  (!%p2987_p5), %s3478_s6, 256, %s403_s2, [#allocation16], %s2812_s0, %s2812_s0, %s2813_s27  }
  0x63   : > { %p2568_p8 = pneg %p2567_p7  ;;  %p2574_p11 = por %p2573_p10, %p2572_p9 }
  0x65   : > { %p2575_p12 = pnand %p2574_p11, %p2568_p8 }
  0x67   : > { %2578 = shalt.err (!%p2575_p12)
}
  0x68   : > { %s3479_s8 = sld [smem:[#allocation44_spill]]  ;;  %s2590_s27 = scalar_lea.vmem %s444_s18, 128 }
  0x69   : > { %p2591_p13 = scmp.ne.s32.totalorder %s444_s18, %s2590_s27  ;;  %p2598_p1 = scmp.lt.s32.totalorder %s444_s18, %s444_s18 }
  0x6a   : > { %p2599_p3 = scmp.lt.s32.totalorder %s2590_s27, %s2590_s27 }
  0x6b   : > { %p2593_p0 = pnand %p2591_p13, %p2993_p6 }
  0x6c   : > { %p2600_p4 = por %p2599_p3, %p2598_p1 }
  0x6d   : > { %p2594_p2 = pneg %p2593_p0 }
  0x6e   : > { %2232 = dma.hbm_to_vmem [thread:$0]  (!%p2987_p5), %s3479_s8, 16, %s430_s19, [#allocation19]  }
  0x6f   : > { %p2601_p7 = pnand %p2600_p4, %p2594_p2 }
  0x71   : > { %2604 = shalt.err (!%p2601_p7)
}
  0x72   : > { %s3480_s10 = sld [smem:[#allocation46_spill]]  ;;  %s1951_s9 = sadd.s32 4294967294, %s2803_s13  }
  0x73   : > { %s45_s14 = sadd.s32 1, %s2795_s29  ;;  %s48_s11 = sadd.s32 1, %s2799_s30 }
  0x74   : > { %p46_p6 = scmp.ge.s32.totalorder %s45_s14, 2  ;;  %s83_s17 = sadd.s32 1, %s2783_s26 }
  0x75   : > { %p90_p8 = scmp.ne.s32.totalorder %s2783_s26, %s2779_s25  ;;  %p91_p9 = scmp.eq.s32.totalorder %s2803_s13, 0 }
  0x76   : > { %s3519_s14 = smov (%p46_p6, %s45_s14), 0  ;;  %s3521_s11 = smov (!%p46_p6, %s48_s11), %s2799_s30 }
  0x77   : > { %3481 = sst [smem:[#allocation34_spill]] %s3519_s14  ;;  %p3065_p10 = por %p91_p9, %p90_p8 }
  0x78   : > { %2235 = dma.hbm_to_vmem [thread:$0]  (!%p2987_p5), %s3480_s10, 128, %s444_s18, [#allocation22]  }
  0x79   : > { %p96_p5 = scmp.ne.s32.totalorder %s2779_s25, %s2775_s24  ;;  %p50_p11 = scmp.ge.s32.totalorder %s3521_s11, 2 }
  0x7a   : > { %s296_s12 = ssub.s32 %s2795_s29, %s3519_s14  ;;  %p3483_p12 = scmp.ne.s32.totalorder %s3470_s15, 0 }
  0x7b   : > { %s300_s20 = sadd.s32 1, %s2771_s23  ;;  %s3523_s11 = smov (%p50_p11, %s3521_s11), 0 }
  0x7c   : > { %p3075_p13 = por %p3483_p12, %p96_p5  ;;  %3485 = sst [smem:[#allocation35_spill]] %s3523_s11 }
  0x7d   : > { %p310_p0 = scmp.ne.s32.totalorder %s2771_s23, %s2767_s22  ;;  %s3486_s3 = sadd.s32 4294967295, %s2803_s13  }
  0x7e   : > { %p311_p2 = scmp.eq.s32.totalorder %s3486_s3, 3  ;;  %s80_s0 = ssub.s32 %s2799_s30, %s3523_s11 }
  0x7f   : > { %p316_p1 = scmp.ne.s32.totalorder %s2767_s22, %s2763_s21  ;;  %p81_p3 = scmp.eq.s32.totalorder %s80_s0, 0 }
  0x80   : > { %s297_s24 = sor.u32 %s296_s12, %s80_s0  ;;  %p3090_p7 = por %p311_p2, %p310_p0 }
  0x81   : > { %p298_p4 = scmp.eq.s32.totalorder %s297_s24, 0  ;;  %p317_p6 = scmp.eq.s32.totalorder %s1951_s9, 3 }
  0x82   : > { %s3095_s4 = scalar_select %p81_p3, %s2783_s26, %s83_s17  }
  0x83   : > { %s3098_s2 = scalar_select %p298_p4, %s2771_s23, %s300_s20  }
  0x84   : > { %p2254_p8 = scmp.lt.s32.totalorder %s2803_s13, 4  ;;  %s465_s5 = sand.u32 1, %s2783_s26  }
  0x85   : > { %s2036_s6 = sshll.u32 %s2799_s30, 8  ;;  %p3103_p9 = por %p317_p6, %p316_p1 }
  0x86   : > { %s1961_s7 = sshll.u32 %s465_s5, 4  ;;  %s3489_s1 = sld [smem:[#allocation37_spill]] }
  0x87   : > { %p3112_p5 = pnand %p2254_p8, %p3065_p10  ;;  %s469_s17 = scalar_lea.vmem [#allocation9], %s1961_s7 }
  0x88   : > { %s476_s9 = sshll.u32 %s469_s17, 4  ;;  %s466_s20 = scalar_lea.sflag [#allocation10], %s465_s5  ;;  %s477_s9 = int_to_ptr.vmem [resolvable:$true] %s476_s9 }
  0x89   : > { %p2607_p11 = pneg %p3112_p5  ;;  %s2618_s10 = scalar_lea.vmem %s477_s9, 256 }
  0x8a   : > { %p2619_p12 = scmp.ne.s32.totalorder %s477_s9, %s2618_s10  ;;  %s2818_s11 = smov [#allocation9]  }
  0x8b   : > { %s2623_s14 = sshll.u32 %s2818_s11, 4  ;;  %s2624_s14 = int_to_ptr.vmem [resolvable:$false] %s2623_s14 }
  0x8c   : > { %s475_s0 = scalar_lea.hbm %s3489_s1, %s2036_s6  ;;  %p2621_p0 = pnand %p2619_p12, %p2607_p11 }
  0x8d   : > { %s2625_s6 = scalar_lea.vmem %s2624_s14, 512  ;;  %p2626_p1 = scmp.lt.s32.totalorder %s477_s9, %s2624_s14 }
  0x8e   : > { %p2622_p2 = pneg %p2621_p0  ;;  %p2627_p10 = scmp.lt.s32.totalorder %s2625_s6, %s2618_s10 }
  0x90   : > { %p2628_p3 = por %p2627_p10, %p2626_p1 }
  0x92   : > { %p2629_p4 = pnand %p2628_p3, %p2622_p2 }
  0x94   : > { %2632 = shalt.err (!%p2629_p4)
}
  0x95   : > { %s2819_s8 = smov 128   ;;  %s2820_s7 = smov 8  }
  0x96   : > { %2239 = dma.hbm_to_vmem [thread:$0]  (!%p3112_p5), %s475_s0, 256, %s477_s9, %s466_s20, %s2819_s8, %s2819_s8, %s2820_s7  }
  0x97   : > { %p3491_p6 = scmp.ne.s32.totalorder %s3471_s16, 0 }
  0x98   : > { %s490_s5 = sand.u32 (!%p3491_p6), 1, %s2779_s25  }
  0x99   : > { %488 = sbr.rel (%p3491_p6) target bundleno = 3806 (0xede), region = 64  ;;  %s3123_s19 = sshll.u32 (!%p3491_p6), %s490_s5, 4 }
  0x9a   : > { %s491_s11 = scalar_lea.sflag (!%p3491_p6), [#allocation10], %s490_s5  ;;  %s494_s14 = scalar_lea.vmem (!%p3491_p6), [#allocation9], %s3123_s19 }
  0x9e   : > { %2734 = dma.done.wait (%p3075_p13), %s491_s11, 256  }
  0x9f   : > { %2736 = vsyncadd (%p3075_p13), %s491_s11, 4294967040  ;;  %p3492_p8 = scmp.ne.s32.totalorder %s3470_s15, 0 }
  0xa1   : > { %2738 = dma.done.wait (%p3492_p8), [#allocation13], 272  }
  0xa2   : > { %2740 = vsyncadd (%p3492_p8), [#allocation13], 4294967024 }
  0xa3   : > { %2742 = dma.done.wait (%p3492_p8), [#allocation16], 272  }
  0xa4   : > { %2744 = vsyncadd (%p3492_p8), [#allocation16], 4294967024 }
  0xa5   : > { %2746 = dma.done.wait (%p3492_p8), [#allocation19], 272  }
  0xa6   : > { %2748 = vsyncadd (%p3492_p8), [#allocation19], 4294967024 }
  0xa7   : > { %2750 = dma.done.wait (%p3492_p8), [#allocation22], 128  }
  0xa8   : > { %2752 = vsyncadd (%p3492_p8), [#allocation22], 4294967168  ;;  %s3493_s10 = sld [smem:[#allocation33_spill]]  ;;  %s3147_s16 = sand.u32 1, %s2767_s22   ;;  %v3157_v0 = vld [vmem:[#allocation21] sm:$0x1] }
  0xa9   : > { %p576_p13 = scmp.lt.s32.totalorder %s2791_s28, 1  ;;  %s1973_s18 = sshll.u32 %s3147_s16, 3  ;;  %v3159_v1 = vld [vmem:[#allocation21 + $0x1] sm:$0x1]  ;;  %v3161_v2 = vld [vmem:[#allocation21 + $0x2] ss:$0 sm:$0xff] }
  0xaa   : > { %s1974_s12 = sshll.u32 %s3147_s16, 2  ;;  %v3163_v3 = vld [vmem:[#allocation21 + $0x3] ss:$0 sm:$0xff]  ;;  %v3165_v4 = vld [vmem:[#allocation21 + $0x4] ss:$0 sm:$0xff]  ;;  %s3494_s8 = sld [smem:[#allocation36_spill]] }
  0xab   : > { %s577_s0 = scalar_select %p576_p13, %s2791_s28, 1  ;;  %v3167_v5 = vld [vmem:[#allocation21 + $0x5] ss:$0 sm:$0xff] }
  0xac   : > { %s3174_s5 = scalar_lea.vmem [#allocation23], %s1973_s18  ;;  %s3176_s11 = scalar_lea.vmem [#allocation24], %s1974_s12 }
  0xad   : > { %s1975_s24 = sshll.u32 %s577_s0, 1 }
  0xae   : > { %p578_p5 = scmp.lt.s32.totalorder %s3493_s10, 1  ;;  %p1977_p11 = scmp.ne.s32.totalorder %s3493_s10, 0 }
  0xaf   : > { %s2823_s19 = smov (!%p1977_p11), 120   ;;  %s2826_s18 = smov (!%p1977_p11), 112  }
  0xb0   : > { %s579_s17 = scalar_select %p578_p5, %s3493_s10, 1 }
  0xb1   : > { %594 = sbr.rel (%p1977_p11) target bundleno = 838 (0x346), region = 100  ;;  %s2825_s10 = smov (!%p1977_p11), 88  }
  0xb2   : > { %s581_s15 = sadd.s32 %s1975_s24, %s579_s17  ;;  %s2827_s12 = smov (!%p1977_p11), 80  }
  0xb3   : > { %s1976_s9 = sshll.u32 %s581_s15, 3  ;;  %s2828_s0 = smov (!%p1977_p11), 104  }
  0xb4   : > { %s3172_s7 = scalar_lea.vmem %s3494_s8, %s1976_s9  ;;  %s2829_s24 = smov (!%p1977_p11), 72  }
  0xb6   : > { %v595_v6 = vld [vmem:[%s494_s14] sm:$0xff]  ;;  %vm597_vm0 = vcmask 261120   ;;  %v596_v7 = vld [vmem:[%s494_s14 + $0x8] sm:$0xff]  ;;  %v2821_v21 = vmov 0.0   ;;  %vm2822_vm1 = vmmov 0   ;;  %v625_v29 = vlaneseq  ;;  %s2824_s14 = smov 96  }
  0xb7   : > { %v598_v8 = vsel %vm597_vm0, %v595_v6, 0.0  ;;  %v601_v9 = vsel %vm597_vm0, %v596_v7, 0.0  ;;  %v2397_v20 = vld [vmem:[#allocation14 + $0x8] sm:$0xff]   ;;  %2084 = vmatprep.subr.bf16.mxu0 %v2821_v21  ;;  %2088 = vmatprep.mubr.msk.bf16.mxu0 %vm2822_vm1, %v2821_v21  ;;  %v2398_v22 = vld [vmem:[#allocation14] sm:$0xff]   ;;  %v1978_v43 = vld [vmem:[#allocation15] ss:$0 sm:$0xff] }
  0xb8   : > { %599 = vadd.xlane.f32.xlu0 %v598_v8  ;;  %2085 = vmatpush3.bf16.msra.mxu0 %v2397_v20  ;;  %v626_v30 = vshrl.u32 %v625_v29, 7  ;;  %vm713_vm2 = vcmask 60416  }
  0xb9   : > { %2086 = vmatprep.subr.bf16.mxu0 %v2821_v21 }
  0xba   : > { %v627_v31 = vsub.s32 0, %v626_v30 }
  0xbc   : > { %602 = vadd.xlane.f32.xlu0 %v601_v9  ;;  %2087 = vmatpush3.bf16.msra.mxu0 %v2398_v22  ;;  %v628_v34 = vrot.slane %v3157_v0, %v627_v31  ;;  %v634_v38 = vrot.slane %v3159_v1, %v627_v31 }
 0x141   : > { %v600_v10 = vpop.xlane.xlu0 %599 }
 0x142   : > { %v605_v11 = vmul.f32 0.03125, %v600_v10 }
 0x144   : > { %v607_v12 = vsub.f32 %v595_v6, %v605_v11 }
 0x145   : > { %v603_v13 = vpop.xlane.xlu0 %602 }
 0x146   : > { %v606_v14 = vmul.f32 0.03125, %v603_v13  ;;  %v609_v15 = vmul.f32 %v607_v12, %v607_v12 }
 0x148   : > { %v608_v16 = vsub.f32 %v596_v7, %v606_v14  ;;  %v611_v17 = vsel %vm597_vm0, %v609_v15, 0.0 }
 0x149   : > { %612 = vadd.xlane.f32.xlu1 %v611_v17 }
 0x14a   : > { %v610_v18 = vmul.f32 %v608_v16, %v608_v16 }
 0x14c   : > { %v614_v19 = vsel %vm597_vm0, %v610_v18, 0.0 }
 0x14d   : > { %615 = vadd.xlane.f32.xlu1 %v614_v19 }
 0x1d2   : > { %v613_v23 = vpop.xlane.xlu1 %612 }
 0x1d3   : > { %v617_v24 = vmul.f32 0.03125, %v613_v23 }
 0x1d5   : > { %v619_v25 = vadd.f32 1e-05, %v617_v24 }
 0x1d6   : > { %v616_v26 = vpop.xlane.xlu1 %615 }
 0x1d7   : > { %2399 = vrsqrt.f32 %v619_v25  ;;  %v618_v27 = vmul.f32 0.03125, %v616_v26 }
 0x1d9   : > { %v620_v28 = vadd.f32 1e-05, %v618_v27 }
 0x1db   : > { %2401 = vrsqrt.f32 %v620_v28 }
 0x1e4   : > { %v2400_v32 = vpop.eup %2399 }
 0x1e5   : > { %v623_v33 = vmul.f32 %v2400_v32, %v607_v12 }
 0x1e7   : > { %v629_v37 = vmul.f32 %v628_v34, %v623_v33 }
 0x1e8   : > { %v2402_v35 = vpop.eup %2401 }
 0x1e9   : > { %v624_v36 = vmul.f32 %v2402_v35, %v608_v16  ;;  %v635_v40 = vadd.f32 %v634_v38, %v629_v37 }
 0x1eb   : > { %v630_v39 = vmul.f32 %v628_v34, %v624_v36 }
 0x1ed   : > { %v636_v41 = vadd.f32 %v634_v38, %v630_v39 }
 0x1ef   : > { %v637_v42 = vpack.c.bf16 %v636_v41, %v635_v40 }
 0x1f1   : > { %2089 = vmatmul.mubr.msk.bf16.vlgmr.msra.gmra.mxu0 %vm597_vm0, %v637_v42 }
 0x2b1   : > { %v698_v44 = vpop.f32.mrf.mxu0 }
 0x2b2   : > { %v699_v45 = vadd.f32 %v1978_v43, %v698_v44 }
 0x2b3   : > { %v2090_v46 = vpop.f32.mrf.mxu0 }
 0x2b4   : > { %v2037_v47 = vpack.c.bf16 %v699_v45, %v699_v45 }
 0x2b5   : > { %v701_v48 = vpop.f32.mrf.mxu0 }
 0x2b6   : > { %714 = vst.msk [vmem:[#allocation2] sm:$0xf] %vm713_vm2, %v2037_v47  ;;  %v702_v49 = vadd.f32 %v1978_v43, %v701_v48  ;;  %724 = vrot.lane.b32.xlu1 %v2037_v47, %s2823_s19  ;;  %716 = vrot.lane.b32.xlu0 %v2037_v47, %s2824_s14 }
 0x2b7   : > { %v2091_v50 = vpop.f32.mrf.mxu0 }
 0x2b8   : > { %v2038_v51 = vpack.c.bf16 %v702_v49, %v702_v49 }
 0x2ba   : > { %715 = vst.msk [vmem:[#allocation2 + $0x4] sm:$0xf] %vm713_vm2, %v2038_v51  ;;  %733 = vrot.lane.b32.xlu0 %v2037_v47, %s2825_s10  ;;  %718 = vrot.lane.b32.xlu1 %v2038_v51, %s2824_s14 }
 0x2be   : > { %742 = vrot.lane.b32.xlu0 %v2037_v47, %s2826_s18  ;;  %726 = vrot.lane.b32.xlu1 %v2038_v51, %s2823_s19 }
 0x2c2   : > { %751 = vrot.lane.b32.xlu0 %v2037_v47, %s2827_s12  ;;  %735 = vrot.lane.b32.xlu1 %v2038_v51, %s2825_s10 }
 0x2c6   : > { %760 = vrot.lane.b32.xlu0 %v2037_v47, %s2828_s0  ;;  %744 = vrot.lane.b32.xlu1 %v2038_v51, %s2826_s18 }
 0x2ca   : > { %769 = vrot.lane.b32.xlu0 %v2037_v47, %s2829_s24  ;;  %753 = vrot.lane.b32.xlu1 %v2038_v51, %s2827_s12 }
 0x2ce   : > { %762 = vrot.lane.b32.xlu1 %v2038_v51, %s2828_s0 }
 0x2d2   : > { %771 = vrot.lane.b32.xlu1 %v2038_v51, %s2829_s24 }
 0x328   : > { %v725_v52 = vpop.permute.xlu1 %724  ;;  %v717_v53 = vpop.permute.xlu0 %716 }
 0x329   : > { %731 = vst.msk [vmem:[#allocation2 + $0x8] sm:$0xf] %vm713_vm2, %v725_v52  ;;  %722 = vst.msk [vmem:[#allocation3] sm:$0xf] %vm713_vm2, %v717_v53 }
 0x32c   : > { %v734_v54 = vpop.permute.xlu0 %733  ;;  %v719_v55 = vpop.permute.xlu1 %718 }
 0x32d   : > { %740 = vst.msk [vmem:[#allocation3 + $0x8] sm:$0xf] %vm713_vm2, %v734_v54  ;;  %723 = vst.msk [vmem:[#allocation3 + $0x4] sm:$0xf] %vm713_vm2, %v719_v55 }
 0x330   : > { %v743_v56 = vpop.permute.xlu0 %742  ;;  %v727_v57 = vpop.permute.xlu1 %726 }
 0x331   : > { %749 = vst.msk [vmem:[#allocation2 + $0x10] sm:$0xf] %vm713_vm2, %v743_v56  ;;  %732 = vst.msk [vmem:[#allocation2 + $0xc] sm:$0xf] %vm713_vm2, %v727_v57 }
 0x334   : > { %v752_v58 = vpop.permute.xlu0 %751  ;;  %v736_v59 = vpop.permute.xlu1 %735 }
 0x335   : > { %758 = vst.msk [vmem:[#allocation3 + $0x10] sm:$0xf] %vm713_vm2, %v752_v58  ;;  %741 = vst.msk [vmem:[#allocation3 + $0xc] sm:$0xf] %vm713_vm2, %v736_v59 }
 0x338   : > { %v761_v60 = vpop.permute.xlu0 %760  ;;  %v745_v61 = vpop.permute.xlu1 %744 }
 0x339   : > { %767 = vst.msk [vmem:[#allocation2 + $0x18] sm:$0xf] %vm713_vm2, %v761_v60  ;;  %750 = vst.msk [vmem:[#allocation2 + $0x14] sm:$0xf] %vm713_vm2, %v745_v61 }
 0x33c   : > { %v770_v62 = vpop.permute.xlu0 %769  ;;  %v754_v63 = vpop.permute.xlu1 %753 }
 0x33d   : > { %776 = vst.msk [vmem:[#allocation3 + $0x18] sm:$0xf] %vm713_vm2, %v770_v62  ;;  %759 = vst.msk [vmem:[#allocation3 + $0x14] sm:$0xf] %vm713_vm2, %v754_v63 }
 0x340   : > { %v763_v6 = vpop.permute.xlu1 %762 }
 0x341   : > { %768 = vst.msk [vmem:[#allocation2 + $0x1c] sm:$0xf] %vm713_vm2, %v763_v6 }
 0x344   : > { %v772_v7 = vpop.permute.xlu1 %771 }
 0x345   : > { %777 = vst.msk [vmem:[#allocation3 + $0x1c] sm:$0xf] %vm713_vm2, %v772_v7 }
 0x346 PF: > { %v3207_v8 = vld [vmem:[%s3172_s7] sm:$0xff]  ;;  %vm779_vm3 = vcmask 261120   ;;  %s3495_s17 = sld [smem:[#allocation33_spill]]  ;;  %vm892_vm4 = vcmask 130048   ;;  %v2830_v16 = vmov 0.0   ;;  %vm2831_vm5 = vmmov 0  }
 0x347   : > { %v780_v9 = vsel %vm779_vm3, %v3207_v8, 0.0  ;;  %s3496_s20 = sld [smem:[#allocation38_spill]]  ;;  %2092 = vmatprep.subr.bf16.mxu0 %v2830_v16  ;;  %893 = vst.msk [vmem:[#allocation7] sm:$0xff] %vm892_vm4, %v2830_v16  ;;  %2096 = vmatprep.mubr.msk.bf16.mxu0 %vm2831_vm5, %v2830_v16  ;;  %v794_v18 = vlaneseq  ;;  %v1984_v33 = vld [vmem:[#allocation12] ss:$0 sm:$0xff]  ;;  %vm872_vm6 = vcmask 60416  }
 0x348   : > { %781 = vadd.xlane.f32.xlu0 %v780_v9  ;;  %894 = vst.msk [vmem:[#allocation8] sm:$0xff] %vm779_vm3, %v2830_v16  ;;  %s2832_s19 = smov 104   ;;  %s2833_s14 = smov 120  }
 0x349   : > { %v795_v19 = vshrl.u32 %v794_v18, 7  ;;  %s2834_s10 = smov 112   ;;  %s3238_s18 = smov 0  }
 0x34b   : > { %v796_v25 = vsub.s32 0, %v795_v19 }
 0x34c   : > { %s1989_s7 = sshll.u32 %s3495_s17, 3 }
 0x34d   : > { %v2403_v15 = vld [vmem:[%s3496_s20 + $0x8] sm:$0xff]   ;;  %v2404_v17 = vld [vmem:[%s3496_s20] sm:$0xff]   ;;  %v898_v20 = vstv %s1989_s7  ;;  %v797_v26 = vrot.slane %v3157_v0, %v796_v25  ;;  %v802_v29 = vrot.slane %v3159_v1, %v796_v25 }
 0x34e   : > { %2093 = vmatpush3.bf16.msra.mxu0 %v2403_v15  ;;  %v3229_v21 = vadd.s32 %v898_v20, %v795_v19 }
 0x34f   : > { %2094 = vmatprep.subr.bf16.mxu0 %v2830_v16 }
 0x352   : > { %2095 = vmatpush3.bf16.msra.mxu0 %v2404_v17 }
 0x3d1   : > { %v782_v10 = vpop.xlane.xlu0 %781 }
 0x3d2   : > { %v784_v11 = vmul.f32 0.03125, %v782_v10 }
 0x3d4   : > { %v785_v12 = vsub.f32 %v3207_v8, %v784_v11 }
 0x3d6   : > { %v786_v13 = vmul.f32 %v785_v12, %v785_v12 }
 0x3d8   : > { %v787_v14 = vsel %vm779_vm3, %v786_v13, 0.0 }
 0x3d9   : > { %788 = vadd.xlane.f32.xlu0 %v787_v14 }
 0x462   : > { %v789_v22 = vpop.xlane.xlu0 %788 }
 0x463   : > { %v790_v23 = vmul.f32 0.03125, %v789_v22 }
 0x465   : > { %v791_v24 = vadd.f32 1e-05, %v790_v23 }
 0x467   : > { %2405 = vrsqrt.f32 %v791_v24 }
 0x474   : > { %v2406_v27 = vpop.eup %2405 }
 0x475   : > { %v793_v28 = vmul.f32 %v2406_v27, %v785_v12 }
 0x477   : > { %v798_v30 = vmul.f32 %v797_v26, %v793_v28 }
 0x479   : > { %v803_v31 = vadd.f32 %v802_v29, %v798_v30 }
 0x47b   : > { %v804_v32 = vpack.c.bf16 %v803_v31, %v803_v31 }
 0x47d   : > { %2097 = vmatmul.mubr.msk.bf16.vlgmr.msra.gmra.mxu0 %vm779_vm3, %v804_v32 }
 0x53d   : > { %v865_v34 = vpop.f32.mrf.mxu0 }
 0x53e   : > { %v866_v35 = vadd.f32 %v1984_v33, %v865_v34 }
 0x53f   : > { %v2098_v36 = vpop.f32.mrf.mxu0 }
 0x540   : > { %v871_v37 = vpack.c.bf16 %v866_v35, %v866_v35 }
 0x541   : > { %v868_v38 = vpop.f32.mrf.mxu0 }
 0x542   : > { %887 = vrot.lane.b32.xlu0 %v871_v37, %s2832_s19  ;;  %877 = vrot.lane.b32.xlu1 %v871_v37, %s2833_s14  ;;  %873 = vst.msk [vmem:[#allocation4] sm:$0xf] %vm872_vm6, %v871_v37 }
 0x543   : > { %v2099_v0 = vpop.f32.mrf.mxu0 }
 0x546   : > { %882 = vrot.lane.b32.xlu1 %v871_v37, %s2834_s10 }
 0x5b4   : > { %v888_v1 = vpop.permute.xlu0 %887  ;;  %v878_v39 = vpop.permute.xlu1 %877 }
 0x5b5   : > { %891 = vst.msk [vmem:[#allocation4 + $0xc] sm:$0xf] %vm872_vm6, %v888_v1  ;;  %881 = vst.msk [vmem:[#allocation4 + $0x4] sm:$0xf] %vm872_vm6, %v878_v39 }
 0x5b8   : > { %v883_v40 = vpop.permute.xlu1 %882 }
 0x5b9   : > { %886 = vst.msk [vmem:[#allocation4 + $0x8] sm:$0xf] %vm872_vm6, %v883_v40 }
 0x5ba LB: >> { %v2835_v41 = vmov -1e+30   ;;  %s2040_s12 = sshll.u32 %s2807_s18, 3  ;;  %s3497_s24 = sld [smem:[#allocation33_spill]]  ;;  %s2807_s18 = sphi %s3238_s18, %s905_s18  }
 0x5bb   : >> { %911 = vst.msk [vmem:[#allocation5] sm:$0xff] %vm892_vm4, %v2835_v41  ;;  %912 = vst.msk [vmem:[#allocation5 + $0x8] sm:$0xff] %vm892_vm4, %v2835_v41  ;;  %s908_s0 = scalar_lea.vmem [#allocation4], %s2040_s12 }
 0x5c0   : >> { %v909_v42 = vld [vmem:[%s908_s0] sm:$0xf]  ;;  %v910_v43 = vld [vmem:[%s908_s0 + $0x4] sm:$0xf]  ;;  %p1992_p12 = scmp.lt.s32.totalorder %s3497_s24, 0 }
 0x5c1   : >> { %s2042_s17 = sshll.u32 (!%p1992_p12), %s2807_s18, 4 }
 0x5c2   : >> { %916 = sbr.rel (%p1992_p12) target bundleno = 1688 (0x698), region = 111  ;;  %s919_s15 = scalar_lea.vmem (!%p1992_p12), [#allocation2], %s2042_s17 }
 0x5c7   : >> { %vm922_vm7 = vcmask 64512   ;;  %v2836_v44 = vmov 0.0   ;;  %v920_v45 = vld [vmem:[%s919_s15] sm:$0xf]  ;;  %v921_v46 = vld [vmem:[%s919_s15 + $0x8] sm:$0xf] }
 0x5c8   : >> { %2100 = vmatprep.subr.bf16.mxu0 %v2836_v44  ;;  %2106 = vmatprep.subr.bf16.mxu1 %v2836_v44  ;;  %vm2837_vm8 = vmmov 0   ;;  %v927_v47 = vsel %vm922_vm7, %v920_v45, 0  ;;  %v973_v48 = vsel %vm922_vm7, %v921_v46, 0  ;;  %v1016_v49 = vand.u32 127, %v794_v18 }
 0x5c9   : >> { %2102 = vmatprep.mubr.msk.bf16.mxu0 %vm2837_vm8, %v2836_v44  ;;  %2108 = vmatprep.mubr.msk.bf16.mxu1 %vm2837_vm8, %v2836_v44 }
 0x5ca   : >> { %2101 = vmatpush3.bf16.xpose.msra.mxu0 %v927_v47  ;;  %2107 = vmatpush3.bf16.xpose.msra.mxu1 %v973_v48  ;;  %vm1017_vm9 = vcmp.ge.s32.totalorder %v3229_v21, %v1016_v49 }
 0x5d1   : >> { %2103 = vmatmul.mubr.msk.bf16.vlgmr.msra.gmra.mxu0 %vm922_vm7, %v909_v42  ;;  %2109 = vmatmul.mubr.msk.bf16.vlgmr.msra.gmra.mxu1 %vm922_vm7, %v910_v43 }
 0x691   : >> { %v963_v50 = vpop.f32.mrf.mxu0  ;;  %v1009_v51 = vpop.f32.mrf.mxu1 }
 0x692   : >> { %v1020_v52 = vsel %vm1017_vm9, %v963_v50, -1e+30  ;;  %v1021_v53 = vsel %vm1017_vm9, %v1009_v51, -1e+30 }
 0x693   : >> { %1022 = vst.msk [vmem:[#allocation5] sm:$0xff] %vm922_vm7, %v1020_v52  ;;  %1023 = vst.msk [vmem:[#allocation5 + $0x8] sm:$0xff] %vm922_vm7, %v1021_v53  ;;  %v2104_v54 = vpop.f32.mrf.mxu0  ;;  %v2110_v55 = vpop.f32.mrf.mxu1 }
 0x695   : >> { %v966_v56 = vpop.f32.mrf.mxu0  ;;  %v1012_v57 = vpop.f32.mrf.mxu1 }
 0x697   : >> { %v2105_v58 = vpop.f32.mrf.mxu0  ;;  %v2111_v59 = vpop.f32.mrf.mxu1 }
 0x698 PF: >> { %1027 = sbr.rel (%p578_p5) target bundleno = 2017 (0x7e1), region = 115  ;;  %s2044_s6 = sshll.u32 (!%p578_p5), %s2807_s18, 4 }
 0x699   : >> { %s1030_s8 = scalar_lea.vmem (!%p578_p5), [#allocation2], %s2044_s6  ;;  %s2840_s7 = smov (!%p578_p5), 8  }
 0x69d   : >> { %vm1033_vm10 = vcmask 64512   ;;  %v2838_v60 = vmov 0.0   ;;  %v1031_v61 = vld [vmem:[%s1030_s8 + $0x4] sm:$0xf]  ;;  %v1032_v62 = vld [vmem:[%s1030_s8 + $0xc] sm:$0xf] }
 0x69e   : >> { %2112 = vmatprep.subr.bf16.mxu0 %v2838_v60  ;;  %2118 = vmatprep.subr.bf16.mxu1 %v2838_v60  ;;  %vm2839_vm11 = vmmov 0   ;;  %v1038_v63 = vsel %vm1033_vm10, %v1031_v61, 0  ;;  %v1084_v6 = vsel %vm1033_vm10, %v1032_v62, 0  ;;  %v1127_v7 = vand.u32 127, %v794_v18 }
 0x69f   : >> { %2114 = vmatprep.mubr.msk.bf16.mxu0 %vm2839_vm11, %v2838_v60  ;;  %2120 = vmatprep.mubr.msk.bf16.mxu1 %vm2839_vm11, %v2838_v60  ;;  %vm1142_vm13 = vcmask 130112  }
 0x6a0   : >> { %2113 = vmatpush3.bf16.xpose.msra.mxu0 %v1038_v63  ;;  %2119 = vmatpush3.bf16.xpose.msra.mxu1 %v1084_v6  ;;  %v1128_v9 = vadd.s32 8, %v1127_v7 }
 0x6a2   : >> { %vm1129_vm12 = vcmp.ge.s32.totalorder %v3229_v21, %v1128_v9 }
 0x6a7   : >> { %2115 = vmatmul.mubr.msk.bf16.vlgmr.msra.gmra.mxu0 %vm1033_vm10, %v909_v42  ;;  %2121 = vmatmul.mubr.msk.bf16.vlgmr.msra.gmra.mxu1 %vm1033_vm10, %v910_v43 }
 0x767   : >> { %v1074_v10 = vpop.f32.mrf.mxu0  ;;  %v1120_v11 = vpop.f32.mrf.mxu1 }
 0x768   : >> { %v1132_v12 = vsel %vm1129_vm12, %v1074_v10, -1e+30  ;;  %v1133_v15 = vsel %vm1129_vm12, %v1120_v11, -1e+30 }
 0x769   : >> { %v2122_v13 = vpop.f32.mrf.mxu1  ;;  %1136 = vrot.lane.b32.xlu0 %v1132_v12, %s2840_s7  ;;  %v2116_v14 = vpop.f32.mrf.mxu0 }
 0x76b   : >> { %v1077_v17 = vpop.f32.mrf.mxu0  ;;  %v1123_v19 = vpop.f32.mrf.mxu1 }
 0x76d   : >> { %v2123_v20 = vpop.f32.mrf.mxu1  ;;  %1138 = vrot.lane.b32.xlu0 %v1133_v15, %s2840_s7  ;;  %v2117_v22 = vpop.f32.mrf.mxu0 }
 0x7db   : >> { %v1137_v23 = vpop.permute.xlu0 %1136 }
 0x7dc   : >> { %1143 = vst.msk [vmem:[#allocation5] sm:$0xff] %vm1142_vm13, %v1137_v23 }
 0x7df   : >> { %v1139_v24 = vpop.permute.xlu0 %1138 }
 0x7e0   : >> { %1144 = vst.msk [vmem:[#allocation5 + $0x8] sm:$0xff] %vm1142_vm13, %v1139_v24 }
 0x7e1 PF: >> { %vm1177_vm14 = vcmask 64512   ;;  %v2841_v0 = vmov 0.0   ;;  %v1171_v46 = vld [vmem:[#allocation7] sm:$0xff]  ;;  %s2046_s14 = sshll.u32 (!%p1992_p12), %s2807_s18, 4 }
 0x7e2   : >> { %1178 = vst.msk [vmem:[#allocation6] sm:$0xff] %vm1177_vm14, %v2841_v0  ;;  %1179 = vst.msk [vmem:[#allocation6 + $0x8] sm:$0xff] %vm1177_vm14, %v2841_v0  ;;  %s1187_s10 = scalar_lea.vmem (!%p1992_p12), [#allocation3], %s2046_s14 }
 0x7e3   : >> { %v1145_v25 = vld [vmem:[#allocation5] sm:$0xff] }
 0x7e4   : >> { %v1147_v27 = vsel %vm892_vm4, %v1145_v25, -inf }
 0x7e5   : >> { %1148 = vmax.xlane.f32.xlu0 %v1147_v27 }
 0x7e7   : >> { %v1146_v26 = vld [vmem:[#allocation5 + $0x8] sm:$0xff] }
 0x7e8   : >> { %v1150_v28 = vsel %vm892_vm4, %v1146_v26, -inf }
 0x7e9   : >> { %1151 = vmax.xlane.f32.xlu0 %v1150_v28 }
 0x86e   : >> { %v1149_v29 = vpop.xlane.xlu0 %1148 }
 0x86f   : >> { %v1153_v30 = vsub.f32 %v1145_v25, %v1149_v29 }
 0x871   : >> { %v1155_v31 = vmul.f32 1.442695, %v1153_v30 }
 0x872   : >> { %v1152_v32 = vpop.xlane.xlu0 %1151 }
 0x873   : >> { %2407 = vpow2.f32 %v1155_v31  ;;  %v1154_v33 = vsub.f32 %v1146_v26, %v1152_v32 }
 0x875   : >> { %v1157_v34 = vmul.f32 1.442695, %v1154_v33 }
 0x877   : >> { %2409 = vpow2.f32 %v1157_v34 }
 0x880   : >> { %v2408_v35 = vpop.eup %2407 }
 0x881   : >> { %v1159_v36 = vsel %vm892_vm4, %v2408_v35, 0.0 }
 0x882   : >> { %1160 = vadd.xlane.f32.xlu1 %v1159_v36 }
 0x884   : >> { %v2410_v37 = vpop.eup %2409 }
 0x885   : >> { %v1162_v38 = vsel %vm892_vm4, %v2410_v37, 0.0 }
 0x886   : >> { %1163 = vadd.xlane.f32.xlu1 %v1162_v38 }
 0x90b   : >> { %v1161_v1 = vpop.xlane.xlu1 %1160 }
 0x90c   : >> { %2411 = vrcp.f32 %v1161_v1 }
 0x90f   : >> { %v1164_v39 = vpop.xlane.xlu1 %1163 }
 0x910   : >> { %2413 = vrcp.f32 %v1164_v39 }
 0x919   : >> { %v2412_v40 = vpop.eup %2411 }
 0x91a   : >> { %v1169_v41 = vmul.f32 %v2412_v40, %v2408_v35 }
 0x91c   : >> { %v1180_v42 = vpack.c.bf16 %v1169_v41, %v1169_v41  ;;  %v1172_v45 = vsel %vm892_vm4, %v1169_v41, 0.0 }
 0x91d   : >> { %v2414_v43 = vpop.eup %2413 }
 0x91e   : >> { %v1170_v44 = vmul.f32 %v2414_v43, %v2410_v37 }
 0x920   : >> { %v1173_v47 = vsel %vm892_vm4, %v1170_v44, 0.0  ;;  %v1181_v48 = vpack.c.bf16 %v1170_v44, %v1170_v44 }
 0x921   : >> { %v1174_v49 = vadd.f32 %v1173_v47, %v1172_v45  ;;  %1184 = sbr.rel (%p1992_p12) target bundleno = 2547 (0x9f3), region = 119 }
 0x923   : >> { %v1175_v50 = vadd.f32 %v1174_v49, %v1171_v46 }
 0x925   : >> { %1176 = vst.msk [vmem:[#allocation7] sm:$0xff] %vm892_vm4, %v1175_v50 }
 0x926   : >> { %vm1195_vm15 = vcmask 1043456   ;;  %v2842_v51 = vmov 0.0   ;;  %v1188_v52 = vld [vmem:[%s1187_s10] sm:$0xf]  ;;  %v1189_v53 = vld [vmem:[%s1187_s10 + $0x8] sm:$0xf] }
 0x927   : >> { %2124 = vmatprep.subr.bf16.mxu0 %v2842_v51  ;;  %2130 = vmatprep.subr.bf16.mxu1 %v2842_v51  ;;  %vm2843_vm0 = vmmov 0   ;;  %v1197_v54 = vsel %vm1195_vm15, %v1188_v52, 0  ;;  %v1243_v55 = vsel %vm1195_vm15, %v1189_v53, 0  ;;  %v1190_v56 = vld [vmem:[#allocation6] sm:$0xff]  ;;  %v1191_v57 = vld [vmem:[#allocation6 + $0x8] sm:$0xff] }
 0x928   : >> { %2126 = vmatprep.mubr.msk.bf16.mxu0 %vm2843_vm0, %v2842_v51  ;;  %2132 = vmatprep.mubr.msk.bf16.mxu1 %vm2843_vm0, %v2842_v51 }
 0x929   : >> { %2125 = vmatpush3.bf16.msra.mxu0 %v1197_v54  ;;  %2131 = vmatpush3.bf16.msra.mxu1 %v1243_v55 }
 0x92c   : >> { %2127 = vmatmul.mubr.msk.bf16.vlgmr.msra.gmra.mxu0 %vm1177_vm14, %v1180_v42  ;;  %2133 = vmatmul.mubr.msk.bf16.vlgmr.msra.gmra.mxu1 %vm1177_vm14, %v1181_v48 }
 0x9ec   : >> { %v1233_v58 = vpop.f32.mrf.mxu0  ;;  %v1279_v59 = vpop.f32.mrf.mxu1 }
 0x9ed   : >> { %v1285_v60 = vadd.f32 %v1233_v58, %v1190_v56  ;;  %v1286_v61 = vadd.f32 %v1279_v59, %v1191_v57 }
 0x9ee   : >> { %v2128_v62 = vpop.f32.mrf.mxu0  ;;  %v2134_v63 = vpop.f32.mrf.mxu1 }
 0x9ef   : >> { %1287 = vst.msk [vmem:[#allocation6] sm:$0xff] %vm1177_vm14, %v1285_v60  ;;  %1288 = vst.msk [vmem:[#allocation6 + $0x8] sm:$0xff] %vm1177_vm14, %v1286_v61 }
 0x9f0   : >> { %v1236_v6 = vpop.f32.mrf.mxu0  ;;  %v1282_v7 = vpop.f32.mrf.mxu1 }
 0x9f2   : >> { %v2129_v9 = vpop.f32.mrf.mxu0  ;;  %v2135_v10 = vpop.f32.mrf.mxu1 }
 0x9f3 PF: >> { %1291 = sbr.rel (%p578_p5) target bundleno = 2870 (0xb36), region = 123  ;;  %s2048_s24 = sshll.u32 (!%p578_p5), %s2807_s18, 4 }
 0x9f4   : >> { %s2844_s17 = smov (!%p578_p5), 120   ;;  %s1294_s15 = scalar_lea.vmem (!%p578_p5), [#allocation3], %s2048_s24 }
 0x9f8   : >> { %vm1305_vm1 = vcmask 1043456   ;;  %1300 = vrot.lane.b32.xlu0 %v1180_v42, %s2844_s17  ;;  %v2845_v11 = vmov 0.0   ;;  %v1295_v12 = vld [vmem:[%s1294_s15 + $0x4] sm:$0xf]  ;;  %vm2846_vm2 = vmmov 0   ;;  %v1298_v25 = vld [vmem:[#allocation6 + $0x8] sm:$0xff] }
 0x9f9   : >> { %2136 = vmatprep.subr.bf16.mxu0 %v2845_v11  ;;  %2138 = vmatprep.mubr.msk.bf16.mxu0 %vm2846_vm2, %v2845_v11  ;;  %v1296_v13 = vld [vmem:[%s1294_s15 + $0xc] sm:$0xf]  ;;  %v1307_v14 = vsel %vm1305_vm1, %v1295_v12, 0  ;;  %v1297_v20 = vld [vmem:[#allocation6] sm:$0xff] }
 0x9fa   : >> { %2142 = vmatprep.subr.bf16.mxu1 %v2845_v11  ;;  %v1356_v15 = vsel %vm1305_vm1, %v1296_v13, 0  ;;  %2144 = vmatprep.mubr.msk.bf16.mxu1 %vm2846_vm2, %v2845_v11 }
 0x9fb   : >> { %2137 = vmatpush3.bf16.msra.mxu0 %v1307_v14  ;;  %2143 = vmatpush3.bf16.msra.mxu1 %v1356_v15 }
 0x9fc   : >> { %1350 = vrot.lane.b32.xlu0 %v1181_v48, %s2844_s17 }
 0xa6a   : >> { %v1301_v17 = vpop.permute.xlu0 %1300 }
 0xa6b   : >> { %2139 = vmatmul.mubr.msk.bf16.vlgmr.msra.gmra.mxu0 %vm1177_vm14, %v1301_v17 }
 0xa6e   : >> { %v1351_v19 = vpop.permute.xlu0 %1350 }
 0xa6f   : >> { %2145 = vmatmul.mubr.msk.bf16.vlgmr.msra.gmra.mxu1 %vm1177_vm14, %v1351_v19 }
 0xb2b   : >> { %v1343_v22 = vpop.f32.mrf.mxu0 }
 0xb2c   : >> { %v1398_v23 = vadd.f32 %v1343_v22, %v1297_v20 }
 0xb2d   : >> { %v2140_v24 = vpop.f32.mrf.mxu0 }
 0xb2e   : >> { %1400 = vst.msk [vmem:[#allocation6] sm:$0xff] %vm1177_vm14, %v1398_v23 }
 0xb2f   : >> { %v1346_v26 = vpop.f32.mrf.mxu0  ;;  %v1392_v27 = vpop.f32.mrf.mxu1 }
 0xb30   : >> { %v1399_v28 = vadd.f32 %v1392_v27, %v1298_v25 }
 0xb31   : >> { %v2141_v29 = vpop.f32.mrf.mxu0  ;;  %v2146_v30 = vpop.f32.mrf.mxu1 }
 0xb32   : >> { %1401 = vst.msk [vmem:[#allocation6 + $0x8] sm:$0xff] %vm1177_vm14, %v1399_v28 }
 0xb33   : >> { %v1395_v31 = vpop.f32.mrf.mxu1 }
 0xb35   : >> { %v2147_v32 = vpop.f32.mrf.mxu1 }
 0xb36 PF: >> { %2148 = vmatprep.subr.bf16.mxu0 %v2841_v0  ;;  %2154 = vmatprep.subr.bf16.mxu1 %v2841_v0  ;;  %vm1413_vm6 = vcmask 1043456   ;;  %v1402_v33 = vld [vmem:[#allocation6] sm:$0xff]  ;;  %s1407_s9 = scalar_lea.vmem [#allocation17], %s2040_s12  ;;  %vm2847_vm7 = vmmov 0   ;;  %v1503_v43 = vld [vmem:[#allocation8] sm:$0xff]  ;;  %s905_s18 = sadd.s32 1, %s2807_s18  }
 0xb37   : >> { %v1408_v35 = vld [vmem:[%s1407_s9] sm:$0xf]  ;;  %v1409_v36 = vld [vmem:[%s1407_s9 + $0x4] sm:$0xf]  ;;  %2150 = vmatprep.mubr.msk.bf16.mxu0 %vm2847_vm7, %v2841_v0  ;;  %2156 = vmatprep.mubr.msk.bf16.mxu1 %vm2847_vm7, %v2841_v0  ;;  %v1404_v1 = vpack.c.bf16 %v1402_v33, %v1402_v33  ;;  %p902_p0 = scmp.ge.s32.totalorder %s905_s18, 2  }
 0xb38   : >> { %v1415_v37 = vsel %vm1413_vm6, %v1408_v35, 0  ;;  %v1461_v38 = vsel %vm1413_vm6, %v1409_v36, 0  ;;  %v2416_v59 = vld [vmem:[#allocation18] sm:$0xff] (%p902_p0)   ;;  %s3501_s6 = sld [smem:[#allocation45_spill]] (%p902_p0)  ;;  %vm1649_vm4 = vcmask (%p902_p0), 523264   ;;  %s2030_s17 = sshll.u32 (%p902_p0), %s2791_s28, 1 }
 0xb39   : >> { %v1403_v34 = vld [vmem:[#allocation6 + $0x8] sm:$0xff]  ;;  %2149 = vmatpush3.bf16.msra.mxu0 %v1415_v37  ;;  %2155 = vmatpush3.bf16.msra.mxu1 %v1461_v38  ;;  %s3502_s24 = sld [smem:[#allocation33_spill]] (%p902_p0)  ;;  %s1731_s18 = sshll.u32 (%p902_p0), %s3176_s11, 4  ;;  %s1732_s18 = int_to_ptr.vmem [resolvable:$true] %s1731_s18 }
 0xb3a   : >> { %v1405_v39 = vpack.c.bf16 %v1403_v34, %v1403_v34  ;;  %2160 = vmatprep.subr.bf16.mxu0 (%p902_p0), %v2830_v16  ;;  %2168 = vmatprep.subr.bf16.mxu1 (%p902_p0), %v2830_v16  ;;  %s3503_s7 = sld [smem:[#allocation48_spill]] (%p902_p0)  ;;  %s1701_s14 = scalar_lea.sflag (%p902_p0), [#allocation25], %s3147_s16 }
 0xb3b   : > { %s2633_s10 = scalar_lea.vmem (%p902_p0), %s1732_s18, 64  ;;  %s2848_s28 = smov (%p902_p0), [#allocation24]  }
 0xb3c   : >> { %2151 = vmatmul.mubr.msk.bf16.vlgmr.msra.gmra.mxu0 %vm1177_vm14, %v1404_v1  ;;  %2157 = vmatmul.mubr.msk.bf16.vlgmr.msra.gmra.mxu1 %vm1177_vm14, %v1405_v39  ;;  %p2634_p2 = scmp.ne.s32.totalorder (%p902_p0), %s1732_s18, %s2633_s10  ;;  %s2637_s0 = sshll.u32 (%p902_p0), %s2848_s28, 4  ;;  %s2638_s0 = int_to_ptr.vmem [resolvable:$false] %s2637_s0 }
 0xb3d   : > { %2164 = vmatprep.mubr.msk.bf16.mxu0 (%p902_p0), %vm2831_vm5, %v2830_v16  ;;  %2176 = vmatprep.mubr.msk.bf16.mxu1 (%p902_p0), %vm2831_vm5, %v2830_v16  ;;  %vm1512_vm5 = vcmask (%p902_p0), 125952   ;;  %p2640_p3 = scmp.lt.s32.totalorder (%p902_p0), %s1732_s18, %s2638_s0 }
 0xb3e   : > { %v2418_v60 = vld [vmem:[%s3501_s6 + $0x10] sm:$0xff] (%p902_p0)   ;;  %v2419_v12 = vld [vmem:[%s3501_s6 + $0x8] sm:$0xff] (%p902_p0)   ;;  %v2420_v13 = vld [vmem:[%s3501_s6] sm:$0xff] (%p902_p0)   ;;  %p2635_p1 = pnand (%p902_p0), %p2634_p2, %p3090_p7 }
 0xb3f   : > { %s3339_s15 = sadd.s32 (%p902_p0), %s3502_s24, %s2030_s17  ;;  %s2639_s24 = scalar_lea.vmem (%p902_p0), %s2638_s0, 128 }
 0xb40   : > { %s2033_s9 = sshll.u32 (%p902_p0), %s3339_s15, 6  ;;  %p2636_p10 = pneg (%p902_p0), %p2635_p1 }
 0xb41   : > { %s1729_s19 = scalar_lea.hbm (%p902_p0), %s3503_s7, %s2033_s9  ;;  %p2641_p4 = scmp.lt.s32.totalorder (%p902_p0), %s2639_s24, %s2633_s10 }
 0xb43   : > { %p2642_p6 = por (%p902_p0), %p2641_p4, %p2640_p3 }
 0xb45   : > { %p2643_p8 = pnand (%p902_p0), %p2642_p6, %p2636_p10 }
 0xbfc   : >> { %v1451_v40 = vpop.f32.mrf.mxu0  ;;  %v1497_v41 = vpop.f32.mrf.mxu1 }
 0xbfd   : >> { %v1504_v42 = vsel %vm779_vm3, %v1451_v40, 0.0  ;;  %v1505_v44 = vsel %vm779_vm3, %v1497_v41, 0.0 }
 0xbfe   : >> { %v1506_v45 = vadd.f32 %v1505_v44, %v1504_v42  ;;  %v2152_v46 = vpop.f32.mrf.mxu0  ;;  %v2158_v0 = vpop.f32.mrf.mxu1  ;;  %904 = sbr.rel (!%p902_p0) target bundleno = 1466 (0x5ba), region = 199 }
 0xc00   : >> { %v1507_v47 = vadd.f32 %v1506_v45, %v1503_v43  ;;  %v1454_v48 = vpop.f32.mrf.mxu0  ;;  %v1500_v49 = vpop.f32.mrf.mxu1 }
 0xc02   : >> { %1508 = vst.msk [vmem:[#allocation8] sm:$0xff] %vm779_vm3, %v1507_v47  ;;  %v2153_v50 = vpop.f32.mrf.mxu0  ;;  %v2159_v51 = vpop.f32.mrf.mxu1 }
 0xc09   : > { %v1514_v52 = vld [vmem:[#allocation8] sm:$0xff] }
 0xc0a   : > { %v1515_v53 = vadd.f32 %v1514_v52, %v3207_v8  ;;  %v2415_v8 = vld [vmem:[#allocation18 + $0x8] sm:$0xff]  }
 0xc0b   : > { %2161 = vmatpush3.bf16.msra.mxu0 %v2415_v8 }
 0xc0c   : > { %v3312_v54 = vadd.f32 %v3165_v4, %v1515_v53  ;;  %2162 = vmatprep.subr.bf16.mxu0 %v2830_v16  ;;  %v2417_v4 = vld [vmem:[%s3501_s6 + $0x18] sm:$0xff]  }
 0xc0d   : > { %2169 = vmatpush3.bf16.msra.mxu1 %v2417_v4 }
 0xc0e   : > { %v1521_v55 = vsel %vm779_vm3, %v3312_v54, 0.0  ;;  %2170 = vmatprep.subr.bf16.mxu1 %v2830_v16 }
 0xc0f   : > { %1522 = vadd.xlane.f32.xlu0 %v1521_v55  ;;  %2163 = vmatpush3.bf16.msra.mxu0 %v2416_v59 }
 0xc11   : > { %2171 = vmatpush3.bf16.msra.mxu1 %v2418_v60 }
 0xc12   : > { %2172 = vmatprep.subr.bf16.mxu1 %v2830_v16 }
 0xc15   : > { %2173 = vmatpush3.bf16.msra.mxu1 %v2419_v12 }
 0xc16   : > { %2174 = vmatprep.subr.bf16.mxu1 %v2830_v16  ;;  %v1509_v16 = vld [vmem:[#allocation7] sm:$0xff] }
 0xc17   : > { %v1510_v23 = vmul.f32 0.25, %v1509_v16 }
 0xc19   : > { %2175 = vmatpush3.bf16.msra.mxu1 %v2420_v13  ;;  %v1511_v24 = vpack.c.bf16 %v1510_v23, %v1510_v23 }
 0xc1b   : > { %1513 = vst.msk [vmem:[%s3176_s11] sm:$0xf] %vm1512_vm5, %v1511_v24 }
 0xc98   : > { %v1523_v18 = vpop.xlane.xlu0 %1522 }
 0xc99   : > { %v1524_v21 = vmul.f32 0.03125, %v1523_v18 }
 0xc9b   : > { %v1525_v56 = vsub.f32 %v3312_v54, %v1524_v21 }
 0xc9d   : > { %v1526_v57 = vmul.f32 %v1525_v56, %v1525_v56 }
 0xc9f   : > { %v1527_v58 = vsel %vm779_vm3, %v1526_v57, 0.0 }
 0xca0   : > { %1528 = vadd.xlane.f32.xlu0 %v1527_v58 }
 0xd29   : > { %v1529_v61 = vpop.xlane.xlu0 %1528 }
 0xd2a   : > { %v1530_v62 = vmul.f32 0.03125, %v1529_v61 }
 0xd2c   : > { %v1531_v63 = vadd.f32 1e-05, %v1530_v62 }
 0xd2e   : > { %2421 = vrsqrt.f32 %v1531_v63 }
 0xd3b   : > { %v2422_v6 = vpop.eup %2421 }
 0xd3c   : > { %v1533_v7 = vmul.f32 %v2422_v6, %v1525_v56 }
 0xd3e   : > { %v1538_v9 = vmul.f32 %v3161_v2, %v1533_v7  ;;  %v2018_v2 = vld [vmem:[#allocation20] ss:$0 sm:$0xff] }
 0xd40   : > { %v1543_v10 = vadd.f32 %v3163_v3, %v1538_v9 }
 0xd42   : > { %v1544_v11 = vpack.c.bf16 %v1543_v10, %v1543_v10 }
 0xd44   : > { %2165 = vmatmul.mubr.msk.bf16.vlgmr.msra.gmra.mxu0 %vm779_vm3, %v1544_v11 }
 0xe04   : > { %v1605_v3 = vpop.f32.mrf.mxu0 }
 0xe05   : > { %v1606_v14 = vadd.f32 %v2018_v2, %v1605_v3 }
 0xe06   : > { %v2166_v15 = vpop.f32.mrf.mxu0 }
 0xe07   : > { %v1611_v17 = vmax.f32 %v1606_v14, 0.0 }
 0xe08   : > { %v1608_v19 = vpop.f32.mrf.mxu0 }
 0xe09   : > { %v1612_v20 = vpack.c.bf16 %v1611_v17, %v1611_v17 }
 0xe0a   : > { %v2167_v22 = vpop.f32.mrf.mxu0 }
 0xe0b   : > { %2177 = vmatmul.mubr.msk.bf16.vlgmr.msra.gmra.mxu1 %vm1649_vm4, %v1612_v20 }
 0xe0c   : > { %2646 = shalt.err (!%p2643_p8)
}
 0xe0d   : > { %s2647_s11 = scalar_lea.hbm %s1729_s19, 64  ;;  %s2651_s12 = scalar_lea.hbm %s3503_s7, 256 }
 0xe0e   : > { %p2648_p13 = scmp.ne.s32.totalorder %s1729_s19, %s2647_s11  ;;  %p2652_p12 = scmp.lt.s32.totalorder %s1729_s19, %s3503_s7 }
 0xe0f   : > { %p2653_p0 = scmp.lt.s32.totalorder %s2651_s12, %s2647_s11 }
 0xe10   : > { %p2649_p5 = pnand %p2648_p13, %p3090_p7 }
 0xe11   : > { %p2654_p2 = por %p2653_p0, %p2652_p12 }
 0xe12   : > { %p2650_p11 = pneg %p2649_p5 }
 0xe14   : > { %p2655_p1 = pnand %p2654_p2, %p2650_p11 }
 0xe16   : > { %2658 = shalt.err (!%p2655_p1)
}
 0xe17   : > { %2211 = dma.vmem_to_hbm [thread:$0]  (%p3090_p7), %s1732_s18, 64, %s1729_s19, %s1701_s14  }
 0xe18   : > { %s2031_s10 = sshll.u32 %s3339_s15, 7  ;;  %s1716_s28 = sshll.u32 %s3174_s5, 4  ;;  %s3369_s28 = int_to_ptr.vmem [resolvable:$true] %s1716_s28 }
 0xe19   : > { %s3504_s24 = sld [smem:[#allocation47_spill]]  ;;  %s1696_s15 = scalar_lea.sflag [#allocation11], %s3147_s16 }
 0xe1a   : > { %s2659_s18 = scalar_lea.vmem %s3369_s28, 128  ;;  %s2849_s19 = smov [#allocation23]  }
 0xe1b   : > { %p2660_p10 = scmp.ne.s32.totalorder %s3369_s28, %s2659_s18  ;;  %s2663_s14 = sshll.u32 %s2849_s19, 4  ;;  %s2664_s14 = int_to_ptr.vmem [resolvable:$false] %s2663_s14 }
 0xe1c   : > { %s2665_s9 = scalar_lea.vmem %s2664_s14, 256  ;;  %p2666_p6 = scmp.lt.s32.totalorder %s3369_s28, %s2664_s14 }
 0xe1d   : > { %p2661_p3 = pnand %p2660_p10, %p3090_p7  ;;  %p2667_p8 = scmp.lt.s32.totalorder %s2665_s9, %s2659_s18 }
 0xe1f   : > { %s3505_s11 = smov %s3504_s24  ;;  %s3367_s17 = scalar_lea.hbm %s3504_s24, %s2031_s10 }
 0xe20   : > { %p2662_p4 = pneg %p2661_p3  ;;  %p2668_p13 = por %p2667_p8, %p2666_p6 }
 0xe22   : > { %p2669_p5 = pnand %p2668_p13, %p2662_p4 }
 0xecb   : > { %v1687_v25 = vpop.f32.mrf.mxu1 }
 0xecc   : > { %v1688_v26 = vadd.f32 %v3167_v5, %v1687_v25 }
 0xecd   : > { %v2178_v27 = vpop.f32.mrf.mxu1 }
 0xece   : > { %v1693_v28 = vadd.f32 %v1688_v26, %v3312_v54 }
 0xecf   : > { %v1690_v29 = vpop.f32.mrf.mxu1 }
 0xed0   : > { %1694 = vst.msk [vmem:[%s3174_s5] sm:$0xff] %vm779_vm3, %v1693_v28 }
 0xed1   : > { %v2179_v30 = vpop.f32.mrf.mxu1 }
 0xed2   : > { %2672 = shalt.err (!%p2669_p5)
}
 0xed3   : > { %s2673_s5 = scalar_lea.hbm %s3367_s17, 128  ;;  %s2677_s8 = scalar_lea.hbm %s3505_s11, 512 }
 0xed4   : > { %p2674_p11 = scmp.ne.s32.totalorder %s3367_s17, %s2673_s5  ;;  %p2678_p2 = scmp.lt.s32.totalorder %s3367_s17, %s3505_s11 }
 0xed5   : > { %p2679_p1 = scmp.lt.s32.totalorder %s2677_s8, %s2673_s5 }
 0xed6   : > { %p2675_p12 = pnand %p2674_p11, %p3090_p7 }
 0xed7   : > { %p2680_p10 = por %p2679_p1, %p2678_p2 }
 0xed8   : > { %p2676_p0 = pneg %p2675_p12 }
 0xeda   : > { %p2681_p3 = pnand %p2680_p10, %p2676_p0 }
 0xedc   : > { %2684 = shalt.err (!%p2681_p3)
}
 0xedd   : > { %2210 = dma.vmem_to_hbm [thread:$0]  (%p3090_p7), %s3369_s28, 128, %s3367_s17, %s1696_s15  }
 0xede PF: > { %p2262_p4 = scmp.ge.s32.totalorder %s2803_s13, 2  ;;  %s1743_s0 = sand.u32 1, %s2763_s21  }
 0xedf   : > { %s1744_s24 = scalar_lea.sflag [#allocation11], %s1743_s0 }
 0xee0   : > { %p2241_p6 = pnand %p2262_p4, %p3103_p9 }
 0xee2   : > { %p2242_p8 = pneg %p2241_p6 }
 0xee4   : > { %2754 = dma.done.wait (%p2242_p8), %s1744_s24, 128  }
 0xee5   : > { %2756 = vsyncadd (%p2242_p8), %s1744_s24, 4294967168  ;;  %s1753_s18 = scalar_lea.sflag [#allocation25], %s1743_s0 }
 0xee6   : > { %2758 = dma.done.wait (%p2242_p8), %s1753_s18, 64  }
 0xee7   : > { %2760 = vsyncadd (%p2242_p8), %s1753_s18, 4294967232  ;;  %s36_s13 = sadd.s32 1, %s2803_s13   ;;  %s3506_s3 = sld [smem:[#allocation34_spill]] }
 0xee8   : > { %p33_p13 = scmp.ge.s32.totalorder %s36_s13, 6   ;;  %s3507_s17 = sld [smem:[#allocation35_spill]] }
 0xee9   : > { %s3508_s21 = smov %s2767_s22  ;;  %s3509_s22 = smov %s2771_s23 }
 0xeea   : > { %s3510_s23 = smov %s3098_s2  ;;  %s3511_s24 = smov %s2779_s25 }
 0xeeb   : > { %s3512_s25 = smov %s2783_s26  ;;  %s3513_s26 = smov %s3095_s4 }
 0xeec   : > { %s3514_s27 = smov %s2795_s29  ;;  %s3515_s28 = smov %s2799_s30 }
 0xeed   : > { %s3516_s29 = smov %s3506_s3  ;;  %35 = sbr.rel (!%p33_p13) target bundleno = 29 (0x1d), region = 210 }
 0xeee   : > { %s3517_s30 = smov %s3507_s17 }
 0xef2   :  { %1758 = vsyncpa [#allocation10], 1 }
 0xef3   :  { %1760 = vsyncpa [#allocation10 + $0x1], 1 }
 0xef4   :  { %1761 = vsyncpa [#allocation13], 1 }
 0xef5   :  { %1762 = vsyncpa [#allocation16], 1 }
 0xef6   :  { %1763 = vsyncpa [#allocation19], 1 }
 0xef7   :  { %1764 = vsyncpa [#allocation22], 1 }
 0xef8   :  { %1765 = vsyncpa [#allocation11], 1 }
 0xef9   :  { %1767 = vsyncpa [#allocation11 + $0x1], 1 }
 0xefa   :  { %1768 = vsyncpa [#allocation25], 1 }
 0xefb   :  { %1770 = vsyncpa [#allocation25 + $0x1], 1 }

</bundles_post_ra>
